<compile_context>
chip_gen: v7x
topology: tpu7x:2x2x1
jax: 0.10.0
libtpu: 0.0.40
codegen_flags: <defaults>
</compile_context>

<pallas_src>
import numpy as np
import jax
import jax.numpy as jnp
from jax import lax
from jax.experimental import pallas as pl
from jax.experimental.pallas import tpu as pltpu

L = 20                 # sequence length implied by fc1 (32 * 20 = 640)
C1, C2, C3 = 8, 16, 32
H1, H2, H3 = 256, 128, 64


def _round_up(n, m):
    return ((n + m - 1) // m) * m


def ae_regressor_kernel(x_ref,
                        m1_ref, bb1_ref, m2_ref, bb2_ref, m3_ref, bb3_ref,
                        wf1_ref, bf1_ref, wf2_ref, bf2_ref,
                        wf3_ref, bf3_ref, wf4_ref, bf4_ref,
                        out_ref):
    bf16 = jnp.bfloat16
    f32 = jnp.float32

    x = x_ref[...].astype(bf16)                                   # (TB, 20)

    # ---- conv1/conv2/conv3 as dense banded matmuls (lane-dense rank-2) ----------
    # bias + ReLU in f32 (no bf16 VALU on v5e); only matmul operands are bf16.
    h = jnp.dot(x, m1_ref[...], preferred_element_type=f32) + bb1_ref[...]
    h = jnp.maximum(h, 0.0).astype(bf16)                          # (TB, 160)
    h = jnp.dot(h, m2_ref[...], preferred_element_type=f32) + bb2_ref[...]
    h = jnp.maximum(h, 0.0).astype(bf16)                          # (TB, 320)
    h = jnp.dot(h, m3_ref[...], preferred_element_type=f32) + bb3_ref[...]
    h = jnp.maximum(h, 0.0).astype(bf16)                          # (TB, 640) == fc1 input

    # ---- fc1 / fc2 (bf16 MXU operands, f32 accumulate / bias / ReLU) ------------
    y = jnp.dot(h, wf1_ref[...], preferred_element_type=f32) + bf1_ref[...]
    y = jnp.maximum(y, 0.0).astype(bf16)                          # (TB, 256)
    y = jnp.dot(y, wf2_ref[...], preferred_element_type=f32) + bf2_ref[...]
    y = jnp.maximum(y, 0.0).astype(bf16)                          # (TB, 128)

    # ---- fc3 + sigmoid (exact divide; exp lands on the EUP) ---------------------
    z = jnp.dot(y, wf3_ref[...], preferred_element_type=f32) + bf3_ref[...]
    s = 1.0 / (1.0 + jnp.exp(-z))                                 # (TB, 64) f32

    # ---- fc4 head: (1,64) . (TB,64)^T -> lane-dense (1, TB) output row ----------
    outT = lax.dot_general(wf4_ref[...], s, (((1,), (1,)), ((), ())),
                           preferred_element_type=f32)            # (1, TB)
    out_ref[...] = (outT + bf4_ref[...])[None].astype(out_ref.dtype)   # (1, 1, TB)


def _conv_band_matrix(w, L):
    """w: (C_out, C_in, 3) PyTorch Conv1d weight.  Returns (L*C_in, L*C_out) dense
    banded matrix so that `h_flat @ M` implements the k=3, pad=1 cross-correlation,
    with features ordered l-major / channel-minor (index = l * C + c)."""
    w = np.asarray(w, dtype=np.float32)
    C_out, C_in, K = w.shape
    M = np.zeros((L * C_in, L * C_out), np.float32)
    for l_out in range(L):
        for k in range(K):
            l_in = l_out + k - 1                      # padding = 1
            if 0 <= l_in < L:
                M[l_in * C_in:(l_in + 1) * C_in,
                  l_out * C_out:(l_out + 1) * C_out] = w[:, :, k].T
    return jnp.asarray(M)


def prepare_params(params):
    """One-time re-layout of PyTorch-layout weights into kernel layout.
    Call once at model-load time, OUTSIDE jit (uses host-side numpy)."""
    (w1, b1, w2, b2, w3, b3, W1, fb1, W2, fb2, W3, fb3, W4, fb4) = params
    f32, bf16 = jnp.float32, jnp.bfloat16

    M1 = _conv_band_matrix(w1, L).astype(bf16)        # (20, 160)
    M2 = _conv_band_matrix(w2, L).astype(bf16)        # (160, 320)
    M3 = _conv_band_matrix(w3, L).astype(bf16)        # (320, 640)
    bb1 = jnp.tile(b1.astype(f32), (L,))[None, :]     # (1, 160): index l*C1+c -> b1[c]
    bb2 = jnp.tile(b2.astype(f32), (L,))[None, :]     # (1, 320)
    bb3 = jnp.tile(b3.astype(f32), (L,))[None, :]     # (1, 640)

    # fc1 weight is (H1, C3*L) with PyTorch NCL flatten (feature = c*L + l);
    # re-layout to (L*C3, H1) with row index l*C3 + c to match the band matrices.
    wf1 = jnp.transpose(W1.reshape(H1, C3, L), (2, 1, 0)).reshape(L * C3, H1).astype(bf16)
    wf2 = W2.T.astype(bf16)                           # (256, 128)
    wf3 = W3.T.astype(bf16)                           # (128, 64)
    wf4 = W4.astype(f32)                              # (1, 64) row for the head contraction

    return (M1, bb1, M2, bb2, M3, bb3,
            wf1, fb1.reshape(1, H1).astype(f32),
            wf2, fb2.reshape(1, H2).astype(f32),
            wf3, fb3.reshape(1, H3).astype(f32),
            wf4, fb4.reshape(1, 1).astype(f32))


def ae_regressor_forward(x, prepped, *, tile_b=1024):
    """x: (B, L) float32, prepped = prepare_params(params). Returns (B, 1) float32."""
    B = x.shape[0]
    tb = _round_up(min(tile_b, _round_up(max(B, 1), 8)), 8)   # batch tile, multiple of 8
    B_pad = _round_up(B, tb)
    steps = B_pad // tb
    if steps > 1 and steps % 2:      # even step count so both v7x TensorCores get work
        steps += 1
        B_pad = steps * tb

    x_in = x.astype(jnp.float32)                              # rank-2 (B, L), lane-dense
    if B_pad != B:
        x_in = jnp.pad(x_in, ((0, B_pad - B), (0, 0)))

    weights = prepped

    def resident(a):   # whole array, same block every grid step -> stays VMEM-resident
        return pl.BlockSpec(a.shape, lambda i, _nd=a.ndim: (0,) * _nd)

    out = pl.pallas_call(
        ae_regressor_kernel,
        out_shape=jax.ShapeDtypeStruct((steps, 1, tb), jnp.float32),
        grid=(steps,),
        in_specs=[pl.BlockSpec((tb, L), lambda i: (i, 0))]
                 + [resident(w) for w in weights],
        out_specs=pl.BlockSpec((1, 1, tb), lambda i: (i, 0, 0)),
        compiler_params=pltpu.CompilerParams(
            dimension_semantics=("parallel",),        # megacore sharding on v7x
            vmem_limit_bytes=64 * 1024 * 1024),       # headroom for tile_b>=1024 on v5e
    )(x_in, *weights)
    return out.reshape(-1)[:B, None]


def init_params(key):
    """Deterministic synthetic init (xavier-uniform weights, small uniform biases)."""
    def xavier(k, shape, fan_in, fan_out):
        bound = (6.0 / (fan_in + fan_out)) ** 0.5
        return jax.random.uniform(k, shape, jnp.float32, -bound, bound)

    ks = jax.random.split(key, 14)
    w1 = xavier(ks[0], (C1, 1, 3), 1 * 3, C1 * 3)
    b1 = jax.random.uniform(ks[1], (C1,), jnp.float32, -0.1, 0.1)
    w2 = xavier(ks[2], (C2, C1, 3), C1 * 3, C2 * 3)
    b2 = jax.random.uniform(ks[3], (C2,), jnp.float32, -0.1, 0.1)
    w3 = xavier(ks[4], (C3, C2, 3), C2 * 3, C3 * 3)
    b3 = jax.random.uniform(ks[5], (C3,), jnp.float32, -0.1, 0.1)
    W1 = xavier(ks[6], (H1, C3 * L), C3 * L, H1)
    fb1 = jax.random.uniform(ks[7], (H1,), jnp.float32, -0.05, 0.05)
    W2 = xavier(ks[8], (H2, H1), H1, H2)
    fb2 = jax.random.uniform(ks[9], (H2,), jnp.float32, -0.05, 0.05)
    W3 = xavier(ks[10], (H3, H2), H2, H3)
    fb3 = jax.random.uniform(ks[11], (H3,), jnp.float32, -0.05, 0.05)
    W4 = xavier(ks[12], (1, H3), H3, 1)
    fb4 = jax.random.uniform(ks[13], (1,), jnp.float32, -0.05, 0.05)
    return (w1, b1, w2, b2, w3, b3, W1, fb1, W2, fb2, W3, fb3, W4, fb4)


def ref_forward(x, params):
    """Pure-JAX f32 reference mirroring the PyTorch forward (NCL convs + flatten)."""
    (w1, b1, w2, b2, w3, b3, W1, fb1, W2, fb2, W3, fb3, W4, fb4) = params
    h = x[:, None, :]                                  # (B, 1, L)
    for (w, b) in ((w1, b1), (w2, b2), (w3, b3)):
        h = lax.conv_general_dilated(h, w, window_strides=(1,), padding=((1, 1),),
                                     dimension_numbers=('NCH', 'OIH', 'NCH'))
        h = jax.nn.relu(h + b[None, :, None])
    flat = h.reshape(h.shape[0], -1)                   # (B, 640), order c*L + l
    y = jax.nn.relu(flat @ W1.T + fb1)
    y = jax.nn.relu(y @ W2.T + fb2)
    y = jax.nn.sigmoid(y @ W3.T + fb3)
    return y @ W4.T + fb4


if __name__ == "__main__":
    key = jax.random.PRNGKey(0)
    pkey, xkey = jax.random.split(key)
    params = init_params(pkey)
    prepped = prepare_params(params)                   # hoisted weight prep (once)

    # Small required case (B=2) and a multi-tile case exercising the batch grid,
    # even-step padding and the remainder handling.
    x_small = jax.random.normal(xkey, (2, L), jnp.float32)
    x_big = jax.random.normal(jax.random.fold_in(xkey, 1), (40, L), jnp.float32)

    fwd_small = jax.jit(lambda v: ae_regressor_forward(v, prepped))
    fwd_big = jax.jit(lambda v: ae_regressor_forward(v, prepped, tile_b=16))

    out_s = jax.block_until_ready(fwd_small(x_small))
    out_b = jax.block_until_ready(fwd_big(x_big))
    ref_s = jax.block_until_ready(ref_forward(x_small, params))
    ref_b = jax.block_until_ready(ref_forward(x_big, params))

    assert out_s.shape == (2, 1), out_s.shape
    assert out_b.shape == (40, 1), out_b.shape
    # bf16 MXU operands (with f32 accumulation) -> tolerance relaxed vs f32 reference.
    assert jnp.allclose(out_s, ref_s, atol=2e-2, rtol=2e-2), (out_s, ref_s)
    assert jnp.allclose(out_b, ref_b, atol=2e-2, rtol=2e-2), (out_b, ref_b)
    print("KERNEL_OK")
</pallas_src>

<mosaic_0001>
module attributes {stable_mosaic.version = 11 : i64} {
  func.func @ae_regressor_kernel(%arg0: i32, %arg1: memref<8x20xf32, #tpu.memory_space<vmem>>, %arg2: memref<20x160xbf16, #tpu.memory_space<vmem>>, %arg3: memref<1x160xf32, #tpu.memory_space<vmem>>, %arg4: memref<160x320xbf16, #tpu.memory_space<vmem>>, %arg5: memref<1x320xf32, #tpu.memory_space<vmem>>, %arg6: memref<320x640xbf16, #tpu.memory_space<vmem>>, %arg7: memref<1x640xf32, #tpu.memory_space<vmem>>, %arg8: memref<640x256xbf16, #tpu.memory_space<vmem>>, %arg9: memref<1x256xf32, #tpu.memory_space<vmem>>, %arg10: memref<256x128xbf16, #tpu.memory_space<vmem>>, %arg11: memref<1x128xf32, #tpu.memory_space<vmem>>, %arg12: memref<128x64xbf16, #tpu.memory_space<vmem>>, %arg13: memref<1x64xf32, #tpu.memory_space<vmem>>, %arg14: memref<1x64xf32, #tpu.memory_space<vmem>>, %arg15: memref<1x1xf32, #tpu.memory_space<vmem>>, %arg16: memref<1x1x8xf32, #tpu.memory_space<vmem>>) attributes {dimension_semantics = [#tpu.dimension_semantics<parallel>], iteration_bounds = array<i64: 1>, scalar_prefetch = 0 : i64, scratch_operands = 0 : i64, tpu.core_type = #tpu.core_type<tc>, window_params = [{transform_indices = @transform_0, window_bounds = array<i64: 8, 20>}, {pipeline_mode = #tpu.pipeline_mode<synchronous>, transform_indices = @transform_1, window_bounds = array<i64: 20, 160>}, {pipeline_mode = #tpu.pipeline_mode<synchronous>, transform_indices = @transform_2, window_bounds = array<i64: 1, 160>}, {pipeline_mode = #tpu.pipeline_mode<synchronous>, transform_indices = @transform_3, window_bounds = array<i64: 160, 320>}, {pipeline_mode = #tpu.pipeline_mode<synchronous>, transform_indices = @transform_4, window_bounds = array<i64: 1, 320>}, {pipeline_mode = #tpu.pipeline_mode<synchronous>, transform_indices = @transform_5, window_bounds = array<i64: 320, 640>}, {pipeline_mode = #tpu.pipeline_mode<synchronous>, transform_indices = @transform_6, window_bounds = array<i64: 1, 640>}, {pipeline_mode = #tpu.pipeline_mode<synchronous>, transform_indices = @transform_7, window_bounds = array<i64: 640, 256>}, {pipeline_mode = #tpu.pipeline_mode<synchronous>, transform_indices = @transform_8, window_bounds = array<i64: 1, 256>}, {pipeline_mode = #tpu.pipeline_mode<synchronous>, transform_indices = @transform_9, window_bounds = array<i64: 256, 128>}, {pipeline_mode = #tpu.pipeline_mode<synchronous>, transform_indices = @transform_10, window_bounds = array<i64: 1, 128>}, {pipeline_mode = #tpu.pipeline_mode<synchronous>, transform_indices = @transform_11, window_bounds = array<i64: 128, 64>}, {pipeline_mode = #tpu.pipeline_mode<synchronous>, transform_indices = @transform_12, window_bounds = array<i64: 1, 64>}, {pipeline_mode = #tpu.pipeline_mode<synchronous>, transform_indices = @transform_13, window_bounds = array<i64: 1, 64>}, {pipeline_mode = #tpu.pipeline_mode<synchronous>, transform_indices = @transform_14, window_bounds = array<i64: 1, 1>}, {transform_indices = @transform_15, window_bounds = array<i64: 1, 1, 8>}]} {
    %c0 = arith.constant 0 : index
    %c0_0 = arith.constant 0 : index
    %0 = vector.load %arg1[%c0, %c0_0] : memref<8x20xf32, #tpu.memory_space<vmem>>, vector<8x20xf32>
    %1 = arith.truncf %0 : vector<8x20xf32> to vector<8x20xbf16>
    %c0_1 = arith.constant 0 : index
    %c0_2 = arith.constant 0 : index
    %2 = vector.load %arg2[%c0_1, %c0_2] : memref<20x160xbf16, #tpu.memory_space<vmem>>, vector<20x160xbf16>
    %cst = arith.constant dense<0.000000e+00> : vector<8x160xf32>
    %3 = tpu.matmul %1, %2, %cst {dimension_numbers = #tpu.dot_dimension_numbers<[1], [0], [0], [1], [0, 0, 1, 1], [], []>} : vector<8x20xbf16>, vector<20x160xbf16>, vector<8x160xf32> -> vector<8x160xf32>
    %c0_3 = arith.constant 0 : index
    %c0_4 = arith.constant 0 : index
    %4 = vector.load %arg3[%c0_3, %c0_4] : memref<1x160xf32, #tpu.memory_space<vmem>>, vector<1x160xf32>
    %5 = vector.broadcast %4 : vector<1x160xf32> to vector<8x160xf32>
    %6 = arith.addf %3, %5 : vector<8x160xf32>
    %cst_5 = arith.constant 0.000000e+00 : f32
    %7 = vector.broadcast %cst_5 : f32 to vector<8x160xf32>
    %8 = arith.maximumf %6, %7 : vector<8x160xf32>
    %9 = arith.truncf %8 : vector<8x160xf32> to vector<8x160xbf16>
    %c0_6 = arith.constant 0 : index
    %c0_7 = arith.constant 0 : index
    %10 = vector.load %arg4[%c0_6, %c0_7] : memref<160x320xbf16, #tpu.memory_space<vmem>>, vector<160x320xbf16>
    %cst_8 = arith.constant dense<0.000000e+00> : vector<8x320xf32>
    %11 = tpu.matmul %9, %10, %cst_8 {dimension_numbers = #tpu.dot_dimension_numbers<[1], [0], [0], [1], [0, 0, 1, 1], [], []>} : vector<8x160xbf16>, vector<160x320xbf16>, vector<8x320xf32> -> vector<8x320xf32>
    %c0_9 = arith.constant 0 : index
    %c0_10 = arith.constant 0 : index
    %12 = vector.load %arg5[%c0_9, %c0_10] : memref<1x320xf32, #tpu.memory_space<vmem>>, vector<1x320xf32>
    %13 = vector.broadcast %12 : vector<1x320xf32> to vector<8x320xf32>
    %14 = arith.addf %11, %13 : vector<8x320xf32>
    %cst_11 = arith.constant 0.000000e+00 : f32
    %15 = vector.broadcast %cst_11 : f32 to vector<8x320xf32>
    %16 = arith.maximumf %14, %15 : vector<8x320xf32>
    %17 = arith.truncf %16 : vector<8x320xf32> to vector<8x320xbf16>
    %c0_12 = arith.constant 0 : index
    %c0_13 = arith.constant 0 : index
    %18 = vector.load %arg6[%c0_12, %c0_13] : memref<320x640xbf16, #tpu.memory_space<vmem>>, vector<320x640xbf16>
    %cst_14 = arith.constant dense<0.000000e+00> : vector<8x640xf32>
    %19 = tpu.matmul %17, %18, %cst_14 {dimension_numbers = #tpu.dot_dimension_numbers<[1], [0], [0], [1], [0, 0, 1, 1], [], []>} : vector<8x320xbf16>, vector<320x640xbf16>, vector<8x640xf32> -> vector<8x640xf32>
    %c0_15 = arith.constant 0 : index
    %c0_16 = arith.constant 0 : index
    %20 = vector.load %arg7[%c0_15, %c0_16] : memref<1x640xf32, #tpu.memory_space<vmem>>, vector<1x640xf32>
    %21 = vector.broadcast %20 : vector<1x640xf32> to vector<8x640xf32>
    %22 = arith.addf %19, %21 : vector<8x640xf32>
    %cst_17 = arith.constant 0.000000e+00 : f32
    %23 = vector.broadcast %cst_17 : f32 to vector<8x640xf32>
    %24 = arith.maximumf %22, %23 : vector<8x640xf32>
    %25 = arith.truncf %24 : vector<8x640xf32> to vector<8x640xbf16>
    %c0_18 = arith.constant 0 : index
    %c0_19 = arith.constant 0 : index
    %26 = vector.load %arg8[%c0_18, %c0_19] : memref<640x256xbf16, #tpu.memory_space<vmem>>, vector<640x256xbf16>
    %cst_20 = arith.constant dense<0.000000e+00> : vector<8x256xf32>
    %27 = tpu.matmul %25, %26, %cst_20 {dimension_numbers = #tpu.dot_dimension_numbers<[1], [0], [0], [1], [0, 0, 1, 1], [], []>} : vector<8x640xbf16>, vector<640x256xbf16>, vector<8x256xf32> -> vector<8x256xf32>
    %c0_21 = arith.constant 0 : index
    %c0_22 = arith.constant 0 : index
    %28 = vector.load %arg9[%c0_21, %c0_22] : memref<1x256xf32, #tpu.memory_space<vmem>>, vector<1x256xf32>
    %29 = vector.broadcast %28 : vector<1x256xf32> to vector<8x256xf32>
    %30 = arith.addf %27, %29 : vector<8x256xf32>
    %cst_23 = arith.constant 0.000000e+00 : f32
    %31 = vector.broadcast %cst_23 : f32 to vector<8x256xf32>
    %32 = arith.maximumf %30, %31 : vector<8x256xf32>
    %33 = arith.truncf %32 : vector<8x256xf32> to vector<8x256xbf16>
    %c0_24 = arith.constant 0 : index
    %c0_25 = arith.constant 0 : index
    %34 = vector.load %arg10[%c0_24, %c0_25] : memref<256x128xbf16, #tpu.memory_space<vmem>>, vector<256x128xbf16>
    %cst_26 = arith.constant dense<0.000000e+00> : vector<8x128xf32>
    %35 = tpu.matmul %33, %34, %cst_26 {dimension_numbers = #tpu.dot_dimension_numbers<[1], [0], [0], [1], [0, 0, 1, 1], [], []>} : vector<8x256xbf16>, vector<256x128xbf16>, vector<8x128xf32> -> vector<8x128xf32>
    %c0_27 = arith.constant 0 : index
    %c0_28 = arith.constant 0 : index
    %36 = vector.load %arg11[%c0_27, %c0_28] : memref<1x128xf32, #tpu.memory_space<vmem>>, vector<1x128xf32>
    %37 = vector.broadcast %36 : vector<1x128xf32> to vector<8x128xf32>
    %38 = arith.addf %35, %37 : vector<8x128xf32>
    %cst_29 = arith.constant 0.000000e+00 : f32
    %39 = vector.broadcast %cst_29 : f32 to vector<8x128xf32>
    %40 = arith.maximumf %38, %39 : vector<8x128xf32>
    %41 = arith.truncf %40 : vector<8x128xf32> to vector<8x128xbf16>
    %c0_30 = arith.constant 0 : index
    %c0_31 = arith.constant 0 : index
    %42 = vector.load %arg12[%c0_30, %c0_31] : memref<128x64xbf16, #tpu.memory_space<vmem>>, vector<128x64xbf16>
    %cst_32 = arith.constant dense<0.000000e+00> : vector<8x64xf32>
    %43 = tpu.matmul %41, %42, %cst_32 {dimension_numbers = #tpu.dot_dimension_numbers<[1], [0], [0], [1], [0, 0, 1, 1], [], []>} : vector<8x128xbf16>, vector<128x64xbf16>, vector<8x64xf32> -> vector<8x64xf32>
    %c0_33 = arith.constant 0 : index
    %c0_34 = arith.constant 0 : index
    %44 = vector.load %arg13[%c0_33, %c0_34] : memref<1x64xf32, #tpu.memory_space<vmem>>, vector<1x64xf32>
    %45 = vector.broadcast %44 : vector<1x64xf32> to vector<8x64xf32>
    %46 = arith.addf %43, %45 : vector<8x64xf32>
    %cst_35 = arith.constant 0.000000e+00 : f32
    %47 = vector.broadcast %cst_35 : f32 to vector<8x64xf32>
    %48 = arith.subf %47, %46 : vector<8x64xf32>
    %49 = math.exp %48 : vector<8x64xf32>
    %cst_36 = arith.constant 1.000000e+00 : f32
    %50 = vector.broadcast %cst_36 : f32 to vector<8x64xf32>
    %51 = arith.addf %50, %49 : vector<8x64xf32>
    %cst_37 = arith.constant 1.000000e+00 : f32
    %52 = vector.broadcast %cst_37 : f32 to vector<8x64xf32>
    %53 = arith.divf %52, %51 : vector<8x64xf32>
    %c0_38 = arith.constant 0 : index
    %c0_39 = arith.constant 0 : index
    %54 = vector.load %arg14[%c0_38, %c0_39] : memref<1x64xf32, #tpu.memory_space<vmem>>, vector<1x64xf32>
    %cst_40 = arith.constant dense<0.000000e+00> : vector<1x8xf32>
    %55 = tpu.matmul %54, %53, %cst_40 {dimension_numbers = #tpu.dot_dimension_numbers<[1], [1], [0], [0], [0, 0, 1, 0], [], []>} : vector<1x64xf32>, vector<8x64xf32>, vector<1x8xf32> -> vector<1x8xf32>
    %c0_41 = arith.constant 0 : index
    %c0_42 = arith.constant 0 : index
    %56 = vector.load %arg15[%c0_41, %c0_42] : memref<1x1xf32, #tpu.memory_space<vmem>>, vector<1x1xf32>
    %57 = vector.broadcast %56 : vector<1x1xf32> to vector<1x8xf32>
    %58 = arith.addf %55, %57 : vector<1x8xf32>
    %59 = vector.shape_cast %58 : vector<1x8xf32> to vector<1x1x8xf32>
    %c0_43 = arith.constant 0 : index
    %c0_44 = arith.constant 0 : index
    %c0_45 = arith.constant 0 : index
    %60 = vector.load %arg16[%c0_43, %c0_44, %c0_45] : memref<1x1x8xf32, #tpu.memory_space<vmem>>, vector<1x1x8xf32>
    tpu.vector_store %arg16[%c0_43, %c0_44, %c0_45], %59 {strides = array<i32>} : memref<1x1x8xf32, #tpu.memory_space<vmem>>, vector<1x1x8xf32>,
    return
  }
  func.func @transform_0(%arg0: i32) -> (i32, i32) {
    %c0_i32 = arith.constant 0 : i32
    %c0_i32_0 = arith.constant 0 : i32
    return %arg0, %c0_i32 : i32, i32
  }
  func.func @transform_1(%arg0: i32) -> (i32, i32) {
    %c0_i32 = arith.constant 0 : i32
    %c0_i32_0 = arith.constant 0 : i32
    %c0_i32_1 = arith.constant 0 : i32
    return %c0_i32, %c0_i32_0 : i32, i32
  }
  func.func @transform_2(%arg0: i32) -> (i32, i32) {
    %c0_i32 = arith.constant 0 : i32
    %c0_i32_0 = arith.constant 0 : i32
    %c0_i32_1 = arith.constant 0 : i32
    return %c0_i32, %c0_i32_0 : i32, i32
  }
  func.func @transform_3(%arg0: i32) -> (i32, i32) {
    %c0_i32 = arith.constant 0 : i32
    %c0_i32_0 = arith.constant 0 : i32
    %c0_i32_1 = arith.constant 0 : i32
    return %c0_i32, %c0_i32_0 : i32, i32
  }
  func.func @transform_4(%arg0: i32) -> (i32, i32) {
    %c0_i32 = arith.constant 0 : i32
    %c0_i32_0 = arith.constant 0 : i32
    %c0_i32_1 = arith.constant 0 : i32
    return %c0_i32, %c0_i32_0 : i32, i32
  }
  func.func @transform_5(%arg0: i32) -> (i32, i32) {
    %c0_i32 = arith.constant 0 : i32
    %c0_i32_0 = arith.constant 0 : i32
    %c0_i32_1 = arith.constant 0 : i32
    return %c0_i32, %c0_i32_0 : i32, i32
  }
  func.func @transform_6(%arg0: i32) -> (i32, i32) {
    %c0_i32 = arith.constant 0 : i32
    %c0_i32_0 = arith.constant 0 : i32
    %c0_i32_1 = arith.constant 0 : i32
    return %c0_i32, %c0_i32_0 : i32, i32
  }
  func.func @transform_7(%arg0: i32) -> (i32, i32) {
    %c0_i32 = arith.constant 0 : i32
    %c0_i32_0 = arith.constant 0 : i32
    %c0_i32_1 = arith.constant 0 : i32
    return %c0_i32, %c0_i32_0 : i32, i32
  }
  func.func @transform_8(%arg0: i32) -> (i32, i32) {
    %c0_i32 = arith.constant 0 : i32
    %c0_i32_0 = arith.constant 0 : i32
    %c0_i32_1 = arith.constant 0 : i32
    return %c0_i32, %c0_i32_0 : i32, i32
  }
  func.func @transform_9(%arg0: i32) -> (i32, i32) {
    %c0_i32 = arith.constant 0 : i32
    %c0_i32_0 = arith.constant 0 : i32
    %c0_i32_1 = arith.constant 0 : i32
    return %c0_i32, %c0_i32_0 : i32, i32
  }
  func.func @transform_10(%arg0: i32) -> (i32, i32) {
    %c0_i32 = arith.constant 0 : i32
    %c0_i32_0 = arith.constant 0 : i32
    %c0_i32_1 = arith.constant 0 : i32
    return %c0_i32, %c0_i32_0 : i32, i32
  }
  func.func @transform_11(%arg0: i32) -> (i32, i32) {
    %c0_i32 = arith.constant 0 : i32
    %c0_i32_0 = arith.constant 0 : i32
    %c0_i32_1 = arith.constant 0 : i32
    return %c0_i32, %c0_i32_0 : i32, i32
  }
  func.func @transform_12(%arg0: i32) -> (i32, i32) {
    %c0_i32 = arith.constant 0 : i32
    %c0_i32_0 = arith.constant 0 : i32
    %c0_i32_1 = arith.constant 0 : i32
    return %c0_i32, %c0_i32_0 : i32, i32
  }
  func.func @transform_13(%arg0: i32) -> (i32, i32) {
    %c0_i32 = arith.constant 0 : i32
    %c0_i32_0 = arith.constant 0 : i32
    %c0_i32_1 = arith.constant 0 : i32
    return %c0_i32, %c0_i32_0 : i32, i32
  }
  func.func @transform_14(%arg0: i32) -> (i32, i32) {
    %c0_i32 = arith.constant 0 : i32
    %c0_i32_0 = arith.constant 0 : i32
    %c0_i32_1 = arith.constant 0 : i32
    return %c0_i32, %c0_i32_0 : i32, i32
  }
  func.func @transform_15(%arg0: i32) -> (i32, i32, i32) {
    %c0_i32 = arith.constant 0 : i32
    %c0_i32_0 = arith.constant 0 : i32
    %c0_i32_1 = arith.constant 0 : i32
    return %arg0, %c0_i32, %c0_i32_0 : i32, i32, i32
  }
}

</mosaic_0001>

<bundles_post_ra>
// kernel: _lambda_.1
= control target key start
LH: loop header
LB: loop body
LE: loop exit
PB: predicated region body
PF: predicated region fallthrough
CT: control target
= control target key end

     0   :  { %s4025_s0 = inlined_call_operand.hbm [shape: f32[8,20], index: 0, kind: input, shape index: {}]   ;;  %s4026_s1 = inlined_call_operand.hbm [shape: bf16[20,160], index: 1, kind: input, shape index: {}]   ;;  %s4027_s2 = inlined_call_operand.hbm [shape: f32[1,160], index: 2, kind: input, shape index: {}]   ;;  %s4028_s3 = inlined_call_operand.hbm [shape: bf16[160,320], index: 3, kind: input, shape index: {}]   ;;  %s4029_s4 = inlined_call_operand.hbm [shape: f32[1,320], index: 4, kind: input, shape index: {}]   ;;  %s4030_s5 = inlined_call_operand.hbm [shape: bf16[320,640], index: 5, kind: input, shape index: {}]   ;;  %s4031_s6 = inlined_call_operand.hbm [shape: f32[1,640], index: 6, kind: input, shape index: {}]   ;;  %s4032_s7 = inlined_call_operand.hbm [shape: bf16[640,256], index: 7, kind: input, shape index: {}]   ;;  %s4033_s8 = inlined_call_operand.hbm [shape: f32[1,256], index: 8, kind: input, shape index: {}]   ;;  %s4034_s9 = inlined_call_operand.hbm [shape: bf16[256,128], index: 9, kind: input, shape index: {}]   ;;  %s4035_s10 = inlined_call_operand.hbm [shape: f32[1,128], index: 10, kind: input, shape index: {}]   ;;  %s4036_s11 = inlined_call_operand.hbm [shape: bf16[128,64], index: 11, kind: input, shape index: {}]   ;;  %s4037_s12 = inlined_call_operand.hbm [shape: f32[1,64], index: 12, kind: input, shape index: {}]   ;;  %s4038_s13 = inlined_call_operand.hbm [shape: f32[1,64], index: 13, kind: input, shape index: {}]   ;;  %s4039_s14 = inlined_call_operand.<no memory space> [shape: f32[1,1], index: 14, kind: input, shape index: {}]   ;;  %s4040_s15 = inlined_call_operand.hbm [shape: f32[1,1,8], index: 15, kind: output, shape index: {}]  }
   0x1   :  { %v20_v0 = vstv %s4039_s14 }
   0x2   :  { %21 = vst [vmem:[#allocation2] sm:$0x1] %v20_v0 }
   0x3   :  { %22 = vsyncpa [#allocation4], 0 }
   0x4   :  { %23 = vsyncpa [#allocation7], 0 }
   0x5   :  { %24 = vsyncpa [#allocation10], 0 }
   0x6   :  { %25 = vsyncpa [#allocation13], 0 }
   0x7   :  { %26 = vsyncpa [#allocation16], 0 }
   0x8   :  { %27 = vsyncpa [#allocation19], 0 }
   0x9   :  { %28 = vsyncpa [#allocation22], 0 }
   0xa   :  { %29 = vsyncpa [#allocation25], 0 }
   0xb   :  { %30 = vsyncpa [#allocation5], 0  ;;  %s3649_s20 = smov [#allocation6]   ;;  %s3301_s24 = scalar_lea.hbm %s4026_s1, 384 }
   0xc   :  { %s46_s21 = sshll.u32 %s3649_s20, 4  ;;  %p3302_p0 = scmp.ne.s32.totalorder %s4026_s1, %s3301_s24  ;;  %s47_s21 = int_to_ptr.vmem [resolvable:$true] %s46_s21 }
   0xd   :  { %p3305_p1 = scmp.lt.u32.totalorder %s3301_s24, %s4026_s1 }
   0xf   :  { %p3307_p2 = pnand %p3305_p1, %p3302_p0 }
  0x11   :  { %3310 = shalt.err (!%p3307_p2)
}
  0x12   :  { %s3311_s28 = scalar_lea.vmem %s47_s21, 384  ;;  %p3316_p4 = scmp.lt.s32.totalorder %s47_s21, %s47_s21 }
  0x13   :  { %p3312_p3 = scmp.ne.s32.totalorder %s47_s21, %s3311_s28  ;;  %p3317_p5 = scmp.lt.s32.totalorder %s3311_s28, %s3311_s28 }
  0x15   :  { %p3318_p6 = por %p3317_p5, %p3316_p4 }
  0x17   :  { %p3319_p7 = pnand %p3318_p6, %p3312_p3 }
  0x19   :  { %3322 = shalt.err (!%p3319_p7)
}
  0x1a   :  { %s3650_s29 = smov 128   ;;  %s3651_s30 = smov 8  }
  0x1b   :  { %52 = dma.hbm_to_vmem [thread:$0]  %s4026_s1, 384, %s47_s21, [#allocation7], %s3650_s29, %s3650_s29, %s3651_s30  }
  0x1c   :  { %s3652_s18 = smov [#allocation9]   ;;  %s3323_s23 = scalar_lea.hbm %s4028_s3, 3840 }
  0x1d   :  { %s68_s19 = sshll.u32 %s3652_s18, 4  ;;  %p3324_p8 = scmp.ne.s32.totalorder %s4028_s3, %s3323_s23  ;;  %s69_s19 = int_to_ptr.vmem [resolvable:$true] %s68_s19 }
  0x1e   :  { %p3327_p9 = scmp.lt.u32.totalorder %s3323_s23, %s4028_s3 }
  0x20   :  { %p3329_p10 = pnand %p3327_p9, %p3324_p8 }
  0x22   :  { %3332 = shalt.err (!%p3329_p10)
}
  0x23   :  { %s3333_s27 = scalar_lea.vmem %s69_s19, 3840  ;;  %p3338_p12 = scmp.lt.s32.totalorder %s69_s19, %s69_s19 }
  0x24   :  { %p3334_p11 = scmp.ne.s32.totalorder %s69_s19, %s3333_s27  ;;  %p3339_p13 = scmp.lt.s32.totalorder %s3333_s27, %s3333_s27 }
  0x26   :  { %p3340_p0 = por %p3339_p13, %p3338_p12 }
  0x28   :  { %p3341_p1 = pnand %p3340_p0, %p3334_p11 }
  0x2a   :  { %3344 = shalt.err (!%p3341_p1)
}
  0x2b   :  { %s3653_s1 = smov 192   ;;  %s3654_s21 = smov 12  }
  0x2c   :  { %74 = dma.hbm_to_vmem [thread:$0]  %s4028_s3, 3840, %s69_s19, [#allocation10], %s3653_s1, %s3653_s1, %s3654_s21  }
  0x2d   :  { %s3655_s17 = smov [#allocation12]   ;;  %s3345_s23 = scalar_lea.hbm %s4030_s5, 12800 }
  0x2e   :  { %s90_s18 = sshll.u32 %s3655_s17, 4  ;;  %p3346_p2 = scmp.ne.s32.totalorder %s4030_s5, %s3345_s23  ;;  %s91_s18 = int_to_ptr.vmem [resolvable:$true] %s90_s18 }
  0x2f   :  { %p3349_p3 = scmp.lt.u32.totalorder %s3345_s23, %s4030_s5 }
  0x31   :  { %p3351_p4 = pnand %p3349_p3, %p3346_p2 }
  0x33   :  { %3354 = shalt.err (!%p3351_p4)
}
  0x34   :  { %s3355_s27 = scalar_lea.vmem %s91_s18, 12800  ;;  %p3360_p6 = scmp.lt.s32.totalorder %s91_s18, %s91_s18 }
  0x35   :  { %p3356_p5 = scmp.ne.s32.totalorder %s91_s18, %s3355_s27  ;;  %p3361_p7 = scmp.lt.s32.totalorder %s3355_s27, %s3355_s27 }
  0x37   :  { %p3362_p8 = por %p3361_p7, %p3360_p6 }
  0x39   :  { %p3363_p9 = pnand %p3362_p8, %p3356_p5 }
  0x3b   :  { %3366 = shalt.err (!%p3363_p9)
}
  0x3c   :  { %s3656_s3 = smov 320   ;;  %s3657_s19 = smov 20  }
  0x3d   :  { %96 = dma.hbm_to_vmem [thread:$0]  %s4030_s5, 12800, %s91_s18, [#allocation13], %s3656_s3, %s3656_s3, %s3657_s19  }
  0x3e   :  { %s3658_s28 = smov [#allocation15]   ;;  %s3659_s17 = smov [#allocation18]  }
  0x3f   :  { %s112_s16 = sshll.u32 %s3658_s28, 4  ;;  %s134_s20 = sshll.u32 %s3659_s17, 4  ;;  %s113_s16 = int_to_ptr.vmem [resolvable:$true] %s112_s16  ;;  %s135_s20 = int_to_ptr.vmem [resolvable:$true] %s134_s20 }
  0x40   :  { %s3367_s24 = scalar_lea.hbm %s4032_s7, 10240 }
  0x41   :  { %p3368_p10 = scmp.ne.s32.totalorder %s4032_s7, %s3367_s24  ;;  %p3371_p11 = scmp.lt.u32.totalorder %s3367_s24, %s4032_s7 }
  0x43   :  { %p3373_p12 = pnand %p3371_p11, %p3368_p10 }
  0x45   :  { %3376 = shalt.err (!%p3373_p12)
}
  0x46   :  { %s3377_s5 = scalar_lea.vmem %s113_s16, 10240  ;;  %p3382_p0 = scmp.lt.s32.totalorder %s113_s16, %s113_s16 }
  0x47   :  { %p3378_p13 = scmp.ne.s32.totalorder %s113_s16, %s3377_s5  ;;  %p3383_p1 = scmp.lt.s32.totalorder %s3377_s5, %s3377_s5 }
  0x49   :  { %p3384_p2 = por %p3383_p1, %p3382_p0 }
  0x4b   :  { %p3385_p3 = pnand %p3384_p2, %p3378_p13 }
  0x4d   :  { %3388 = shalt.err (!%p3385_p3)
}
  0x4e   :  { %118 = dma.hbm_to_vmem [thread:$0]  %s4032_s7, 10240, %s113_s16, [#allocation16], %s3650_s29, %s3650_s29, %s3651_s30  }
  0x4f   :  { %s3389_s21 = scalar_lea.hbm %s4034_s9, 2048 }
  0x50   :  { %p3390_p4 = scmp.ne.s32.totalorder %s4034_s9, %s3389_s21  ;;  %p3393_p5 = scmp.lt.u32.totalorder %s3389_s21, %s4034_s9 }
  0x52   :  { %p3395_p6 = pnand %p3393_p5, %p3390_p4 }
  0x54   :  { %3398 = shalt.err (!%p3395_p6)
}
  0x55   :  { %s3399_s24 = scalar_lea.vmem %s135_s20, 2048  ;;  %p3404_p8 = scmp.lt.s32.totalorder %s135_s20, %s135_s20 }
  0x56   :  { %p3400_p7 = scmp.ne.s32.totalorder %s135_s20, %s3399_s24  ;;  %p3405_p9 = scmp.lt.s32.totalorder %s3399_s24, %s3399_s24 }
  0x58   :  { %p3406_p10 = por %p3405_p9, %p3404_p8 }
  0x5a   :  { %p3407_p11 = pnand %p3406_p10, %p3400_p7 }
  0x5c   :  { %3410 = shalt.err (!%p3407_p11)
}
  0x5d   :  { %s3660_s7 = smov 64   ;;  %s3661_s29 = smov 4  }
  0x5e   :  { %140 = dma.hbm_to_vmem [thread:$0]  %s4034_s9, 2048, %s135_s20, [#allocation19], %s3660_s7, %s3660_s7, %s3661_s29  }
  0x5f   :  { %s3662_s25 = smov [#allocation21]   ;;  %s3663_s14 = smov [#allocation3]  }
  0x60   :  { %s156_s26 = sshll.u32 %s3662_s25, 4  ;;  %s37_s27 = sshll.u32 %s3663_s14, 4  ;;  %s157_s26 = int_to_ptr.vmem [resolvable:$true] %s156_s26  ;;  %s38_s27 = int_to_ptr.vmem [resolvable:$true] %s37_s27 }
  0x61   :  { %s3411_s3 = scalar_lea.hbm %s4036_s11, 1024 }
  0x62   :  { %p3412_p12 = scmp.ne.s32.totalorder %s4036_s11, %s3411_s3  ;;  %p3415_p13 = scmp.lt.u32.totalorder %s3411_s3, %s4036_s11 }
  0x64   :  { %p3417_p0 = pnand %p3415_p13, %p3412_p12 }
  0x66   :  { %3420 = shalt.err (!%p3417_p0)
}
  0x67   :  { %s3421_s9 = scalar_lea.vmem %s157_s26, 1024  ;;  %p3426_p2 = scmp.lt.s32.totalorder %s157_s26, %s157_s26 }
  0x68   :  { %p3422_p1 = scmp.ne.s32.totalorder %s157_s26, %s3421_s9  ;;  %p3427_p3 = scmp.lt.s32.totalorder %s3421_s9, %s3421_s9 }
  0x6a   :  { %p3428_p4 = por %p3427_p3, %p3426_p2 }
  0x6c   :  { %p3429_p5 = pnand %p3428_p4, %p3422_p1 }
  0x6e   :  { %3432 = shalt.err (!%p3429_p5)
}
  0x6f   :  { %162 = dma.hbm_to_vmem [thread:$0]  %s4036_s11, 1024, %s157_s26, [#allocation22], %s3660_s7, %s3660_s7, %s3661_s29  }
  0x70   :  { %s3433_s24 = scalar_lea.hbm %s4025_s0, 128 }
  0x71   :  { %p3434_p6 = scmp.ne.s32.totalorder %s4025_s0, %s3433_s24  ;;  %p3437_p7 = scmp.lt.u32.totalorder %s3433_s24, %s4025_s0 }
  0x73   :  { %p3439_p8 = pnand %p3437_p7, %p3434_p6 }
  0x75   :  { %3442 = shalt.err (!%p3439_p8)
}
  0x76   :  { %s3443_s5 = scalar_lea.vmem %s38_s27, 128  ;;  %p3448_p10 = scmp.lt.s32.totalorder %s38_s27, %s38_s27 }
  0x77   :  { %p3444_p9 = scmp.ne.s32.totalorder %s38_s27, %s3443_s5  ;;  %p3449_p11 = scmp.lt.s32.totalorder %s3443_s5, %s3443_s5 }
  0x79   :  { %p3450_p12 = por %p3449_p11, %p3448_p10 }
  0x7b   :  { %p3451_p13 = pnand %p3450_p12, %p3444_p9 }
  0x7d   :  { %3454 = shalt.err (!%p3451_p13)
}
  0x7e   :  { %40 = dma.hbm_to_vmem [thread:$0]  %s4025_s0, 128, %s38_s27, [#allocation4]  }
  0x7f   :  { %s3664_s29 = smov [#allocation8]   ;;  %s3665_s18 = smov [#allocation11]  }
  0x80   :  { %s59_s26 = sshll.u32 %s3664_s29, 4  ;;  %s81_s3 = sshll.u32 %s3665_s18, 4  ;;  %s60_s26 = int_to_ptr.vmem [resolvable:$true] %s59_s26  ;;  %s82_s3 = int_to_ptr.vmem [resolvable:$true] %s81_s3 }
  0x81   :  { %s3455_s21 = scalar_lea.hbm %s4027_s2, 32 }
  0x82   :  { %p3456_p0 = scmp.ne.s32.totalorder %s4027_s2, %s3455_s21  ;;  %p3459_p1 = scmp.lt.u32.totalorder %s3455_s21, %s4027_s2 }
  0x84   :  { %p3461_p2 = pnand %p3459_p1, %p3456_p0 }
  0x86   :  { %3464 = shalt.err (!%p3461_p2)
}
  0x87   :  { %s3465_s0 = scalar_lea.vmem %s60_s26, 32  ;;  %p3470_p4 = scmp.lt.s32.totalorder %s60_s26, %s60_s26 }
  0x88   :  { %p3466_p3 = scmp.ne.s32.totalorder %s60_s26, %s3465_s0  ;;  %p3471_p5 = scmp.lt.s32.totalorder %s3465_s0, %s3465_s0 }
  0x8a   :  { %p3472_p6 = por %p3471_p5, %p3470_p4 }
  0x8c   :  { %p3473_p7 = pnand %p3472_p6, %p3466_p3 }
  0x8e   :  { %3476 = shalt.err (!%p3473_p7)
}
  0x8f   :  { %62 = dma.hbm_to_vmem [thread:$0]  %s4027_s2, 32, %s60_s26, [#allocation7]  }
  0x90   :  { %s3477_s30 = scalar_lea.hbm %s4029_s4, 48 }
  0x91   :  { %p3478_p8 = scmp.ne.s32.totalorder %s4029_s4, %s3477_s30  ;;  %p3481_p9 = scmp.lt.u32.totalorder %s3477_s30, %s4029_s4 }
  0x93   :  { %p3483_p10 = pnand %p3481_p9, %p3478_p8 }
  0x95   :  { %3486 = shalt.err (!%p3483_p10)
}
  0x96   :  { %s3487_s11 = scalar_lea.vmem %s82_s3, 48  ;;  %s3491_s7 = scalar_lea.vmem %s82_s3, 64 }
  0x97   :  { %p3488_p11 = scmp.ne.s32.totalorder %s82_s3, %s3487_s11  ;;  %p3492_p12 = scmp.lt.s32.totalorder %s82_s3, %s82_s3 }
  0x98   :  { %p3493_p13 = scmp.lt.s32.totalorder %s3491_s7, %s3487_s11 }
  0x9a   :  { %p3494_p0 = por %p3493_p13, %p3492_p12 }
  0x9c   :  { %p3495_p1 = pnand %p3494_p0, %p3488_p11 }
  0x9e   :  { %3498 = shalt.err (!%p3495_p1)
}
  0x9f   :  { %84 = dma.hbm_to_vmem [thread:$0]  %s4029_s4, 48, %s82_s3, [#allocation10]  }
  0xa0   :  { %s3666_s26 = smov [#allocation14]   ;;  %s3667_s19 = smov [#allocation17]  }
  0xa1   :  { %s103_s18 = sshll.u32 %s3666_s26, 4  ;;  %s125_s1 = sshll.u32 %s3667_s19, 4  ;;  %s104_s18 = int_to_ptr.vmem [resolvable:$true] %s103_s18  ;;  %s126_s1 = int_to_ptr.vmem [resolvable:$true] %s125_s1 }
  0xa2   :  { %s3499_s9 = scalar_lea.hbm %s4031_s6, 80 }
  0xa3   :  { %p3500_p2 = scmp.ne.s32.totalorder %s4031_s6, %s3499_s9  ;;  %p3503_p3 = scmp.lt.u32.totalorder %s3499_s9, %s4031_s6 }
  0xa5   :  { %p3505_p4 = pnand %p3503_p3, %p3500_p2 }
  0xa7   :  { %3508 = shalt.err (!%p3505_p4)
}
  0xa8   :  { %s3509_s4 = scalar_lea.vmem %s104_s18, 80  ;;  %s3513_s3 = scalar_lea.vmem %s104_s18, 96 }
  0xa9   :  { %p3510_p5 = scmp.ne.s32.totalorder %s104_s18, %s3509_s4  ;;  %p3514_p6 = scmp.lt.s32.totalorder %s104_s18, %s104_s18 }
  0xaa   :  { %p3515_p7 = scmp.lt.s32.totalorder %s3513_s3, %s3509_s4 }
  0xac   :  { %p3516_p8 = por %p3515_p7, %p3514_p6 }
  0xae   :  { %p3517_p9 = pnand %p3516_p8, %p3510_p5 }
  0xb0   :  { %3520 = shalt.err (!%p3517_p9)
}
  0xb1   :  { %106 = dma.hbm_to_vmem [thread:$0]  %s4031_s6, 80, %s104_s18, [#allocation13]  }
  0xb2   :  { %s3521_s16 = scalar_lea.hbm %s4033_s8, 32 }
  0xb3   :  { %p3522_p10 = scmp.ne.s32.totalorder %s4033_s8, %s3521_s16  ;;  %p3525_p11 = scmp.lt.u32.totalorder %s3521_s16, %s4033_s8 }
  0xb5   :  { %p3527_p12 = pnand %p3525_p11, %p3522_p10 }
  0xb7   :  { %3530 = shalt.err (!%p3527_p12)
}
  0xb8   :  { %s3531_s7 = scalar_lea.vmem %s126_s1, 32  ;;  %p3536_p0 = scmp.lt.s32.totalorder %s126_s1, %s126_s1 }
  0xb9   :  { %p3532_p13 = scmp.ne.s32.totalorder %s126_s1, %s3531_s7  ;;  %p3537_p1 = scmp.lt.s32.totalorder %s3531_s7, %s3531_s7 }
  0xbb   :  { %p3538_p2 = por %p3537_p1, %p3536_p0 }
  0xbd   :  { %p3539_p3 = pnand %p3538_p2, %p3532_p13 }
  0xbf   :  { %3542 = shalt.err (!%p3539_p3)
}
  0xc0   :  { %128 = dma.hbm_to_vmem [thread:$0]  %s4033_s8, 32, %s126_s1, [#allocation16]  }
  0xc1   :  { %s3668_s29 = smov [#allocation20]   ;;  %s3669_s18 = smov [#allocation23]  }
  0xc2   :  { %s147_s26 = sshll.u32 %s3668_s29, 4  ;;  %s169_s19 = sshll.u32 %s3669_s18, 4  ;;  %s148_s26 = int_to_ptr.vmem [resolvable:$true] %s147_s26  ;;  %s170_s19 = int_to_ptr.vmem [resolvable:$true] %s169_s19 }
  0xc3   :  { %s3543_s9 = scalar_lea.hbm %s4035_s10, 16 }
  0xc4   :  { %p3544_p4 = scmp.ne.s32.totalorder %s4035_s10, %s3543_s9  ;;  %p3547_p5 = scmp.lt.u32.totalorder %s3543_s9, %s4035_s10 }
  0xc6   :  { %p3549_p6 = pnand %p3547_p5, %p3544_p4 }
  0xc8   :  { %3552 = shalt.err (!%p3549_p6)
}
  0xc9   :  { %s3553_s8 = scalar_lea.vmem %s148_s26, 16  ;;  %s3557_s1 = scalar_lea.vmem %s148_s26, 32 }
  0xca   :  { %p3554_p7 = scmp.ne.s32.totalorder %s148_s26, %s3553_s8  ;;  %p3558_p8 = scmp.lt.s32.totalorder %s148_s26, %s148_s26 }
  0xcb   :  { %p3559_p9 = scmp.lt.s32.totalorder %s3557_s1, %s3553_s8 }
  0xcd   :  { %p3560_p10 = por %p3559_p9, %p3558_p8 }
  0xcf   :  { %p3561_p11 = pnand %p3560_p10, %p3554_p7 }
  0xd1   :  { %3564 = shalt.err (!%p3561_p11)
}
  0xd2   :  { %150 = dma.hbm_to_vmem [thread:$0]  %s4035_s10, 16, %s148_s26, [#allocation19]  }
  0xd3   :  { %s3565_s24 = scalar_lea.hbm %s4037_s12, 16 }
  0xd4   :  { %p3566_p12 = scmp.ne.s32.totalorder %s4037_s12, %s3565_s24  ;;  %p3569_p13 = scmp.lt.u32.totalorder %s3565_s24, %s4037_s12 }
  0xd6   :  { %p3571_p0 = pnand %p3569_p13, %p3566_p12 }
  0xd8   :  { %3574 = shalt.err (!%p3571_p0)
}
  0xd9   :  { %s3575_s5 = scalar_lea.vmem %s170_s19, 16  ;;  %s3579_s11 = scalar_lea.vmem %s170_s19, 32 }
  0xda   :  { %p3576_p1 = scmp.ne.s32.totalorder %s170_s19, %s3575_s5  ;;  %p3580_p2 = scmp.lt.s32.totalorder %s170_s19, %s170_s19 }
  0xdb   :  { %p3581_p3 = scmp.lt.s32.totalorder %s3579_s11, %s3575_s5 }
  0xdd   :  { %p3582_p4 = por %p3581_p3, %p3580_p2 }
  0xdf   :  { %p3583_p5 = pnand %p3582_p4, %p3576_p1 }
  0xe1   :  { %3586 = shalt.err (!%p3583_p5)
}
  0xe2   :  { %172 = dma.hbm_to_vmem [thread:$0]  %s4037_s12, 16, %s170_s19, [#allocation22]  }
  0xe3   :  { %s3670_s6 = smov [#allocation24]   ;;  %s3587_s18 = scalar_lea.hbm %s4038_s13, 16 }
  0xe4   :  { %s179_s2 = sshll.u32 %s3670_s6, 4  ;;  %p3588_p6 = scmp.ne.s32.totalorder %s4038_s13, %s3587_s18  ;;  %s180_s2 = int_to_ptr.vmem [resolvable:$true] %s179_s2 }
  0xe5   :  { %p3591_p7 = scmp.lt.u32.totalorder %s3587_s18, %s4038_s13 }
  0xe7   :  { %p3593_p8 = pnand %p3591_p7, %p3588_p6 }
  0xe9   :  { %3596 = shalt.err (!%p3593_p8)
}
  0xea   :  { %s3597_s17 = scalar_lea.vmem %s180_s2, 16  ;;  %s3601_s12 = scalar_lea.vmem %s180_s2, 32 }
  0xeb   :  { %p3598_p9 = scmp.ne.s32.totalorder %s180_s2, %s3597_s17  ;;  %p3602_p10 = scmp.lt.s32.totalorder %s180_s2, %s180_s2 }
  0xec   :  { %p3603_p11 = scmp.lt.s32.totalorder %s3601_s12, %s3597_s17 }
  0xee   :  { %p3604_p12 = por %p3603_p11, %p3602_p10 }
  0xf0   :  { %p3605_p13 = pnand %p3604_p12, %p3598_p9 }
  0xf2   :  { %3608 = shalt.err (!%p3605_p13)
}
  0xf3   :  { %182 = dma.hbm_to_vmem [thread:$0]  %s4038_s13, 16, %s180_s2, [#allocation25]  }
  0xf4   :  { %3631 = dma.done.wait [#allocation4], 128  }
  0xf5   :  { %3632 = vsyncadd [#allocation4], 4294967168 }
  0xf6   :  { %3633 = dma.done.wait [#allocation7], 416  }
  0xf7   :  { %3634 = vsyncadd [#allocation7], 4294966880 }
  0xf8   :  { %3635 = dma.done.wait [#allocation10], 3888  }
  0xf9   :  { %3636 = vsyncadd [#allocation10], 4294963408 }
  0xfa   :  { %3637 = dma.done.wait [#allocation13], 12880  }
  0xfb   :  { %3638 = vsyncadd [#allocation13], 4294954416 }
  0xfc   :  { %3639 = dma.done.wait [#allocation16], 10272  }
  0xfd   :  { %3640 = vsyncadd [#allocation16], 4294957024 }
  0xfe   :  { %3641 = dma.done.wait [#allocation19], 2064  }
  0xff   :  { %3642 = vsyncadd [#allocation19], 4294965232 }
 0x100   :  { %3643 = dma.done.wait [#allocation22], 1040  }
 0x101   :  { %3644 = vsyncadd [#allocation22], 4294966256 }
 0x102   :  { %3645 = dma.done.wait [#allocation25], 16  }
 0x103   :  { %3646 = vsyncadd [#allocation25], 4294967280  ;;  %v3671_v1 = vmov 0   ;;  %v2968_v2 = vld [vmem:[#allocation6 + $0x4] ss:$8 sps:$4 sm:$0xff]   ;;  %vm264_vm0 = vcmask 1041408   ;;  %v235_v58 = vlaneseq }
 0x104   :  { %303 = vmatprep.mubr.bf16.mxu0 %v3671_v1  ;;  %2967 = vset.pattern.permute.xlu0 %v3671_v1  ;;  %v2970_v3 = vld [vmem:[#allocation6] ss:$8 sps:$4 sm:$0xff]   ;;  %v232_v4 = vld [vmem:[#allocation6 + $0x10] sm:$0x33]  ;;  %v228_v5 = vld [vmem:[#allocation3] sm:$0xff]  ;;  %vm260_vm1 = vcmask 162816  }
 0x105   :  { %271 = vmatprep.subr.bf16.mxu0 %v2968_v2  ;;  %v2576_v6 = vcombine.high %v232_v4, %v232_v4  ;;  %v2575_v7 = vcombine.low %v232_v4, %v232_v4  ;;  %v2973_v8 = vld [vmem:[#allocation9 + $0x4] ss:$12 sps:$4 sm:$0xff]   ;;  %v2975_v9 = vld [vmem:[#allocation9] ss:$12 sps:$4 sm:$0xff]   ;;  %v2976_v11 = vld [vmem:[#allocation9 + $0x1c] ss:$12 sps:$4 sm:$0xff]   ;;  %v229_v13 = vpack.c.bf16 %v228_v5, %v228_v5 }
 0x106   :  { %272 = vmatpush1.bf16.msra.mxu0 %v2970_v3  ;;  %537 = vmatprep.subr.bf16.mxu1 %v2973_v8  ;;  %v2978_v12 = vld [vmem:[#allocation9 + $0x18] ss:$12 sps:$4 sm:$0xff]   ;;  %v2979_v14 = vld [vmem:[#allocation9 + $0x34] ss:$12 sps:$4 sm:$0xff]   ;;  %v2981_v15 = vld [vmem:[#allocation9 + $0x30] ss:$12 sps:$4 sm:$0xff]  }
 0x107   :  { %2577 = vmatprep.subr.msk.bf16.mxu0 %vm264_vm0, %v2576_v6  ;;  %v266_v10 = vsel %vm264_vm0, %v2575_v7, 0  ;;  %538 = vmatpush1.bf16.msra.mxu1 %v2975_v9  ;;  %v2982_v16 = vld [vmem:[#allocation9 + $0x4c] ss:$12 sps:$4 sm:$0xff]   ;;  %v2984_v17 = vld [vmem:[#allocation9 + $0x48] ss:$12 sps:$4 sm:$0xff]   ;;  %v3935_v59 = vshrl.u32 %v235_v58, 7 }
 0x108   :  { %539 = vmatprep.subr.bf16.mxu1 %v2976_v11  ;;  %v2985_v18 = vld [vmem:[#allocation9 + $0x64] ss:$12 sps:$4 sm:$0xff]   ;;  %v2987_v19 = vld [vmem:[#allocation9 + $0x60] ss:$12 sps:$4 sm:$0xff]   ;;  %v2988_v20 = vld [vmem:[#allocation9 + $0x7c] ss:$12 sps:$4 sm:$0xff]  }
 0x109   :  { %v2990_v21 = vld [vmem:[#allocation9 + $0x78] ss:$12 sps:$4 sm:$0xff]   ;;  %v2991_v22 = vld [vmem:[#allocation9 + $0x94] ss:$12 sps:$4 sm:$0xff]   ;;  %v2993_v23 = vld [vmem:[#allocation9 + $0x90] ss:$12 sps:$4 sm:$0xff]  }
 0x10a   :  { %274 = vmatpush1.bf16.msra.mxu0 %v266_v10  ;;  %v2994_v24 = vld [vmem:[#allocation9 + $0xac] ss:$12 sps:$4 sm:$0xff]   ;;  %v2996_v25 = vld [vmem:[#allocation9 + $0xa8] ss:$12 sps:$4 sm:$0xff]   ;;  %v2997_v26 = vld [vmem:[#allocation9 + $0xc4] ss:$12 sps:$4 sm:$0xff]  }
 0x10b   :  { %540 = vmatpush1.bf16.msra.mxu1 %v2978_v12  ;;  %v2999_v27 = vld [vmem:[#allocation9 + $0xc0] ss:$12 sps:$4 sm:$0xff]   ;;  %v3000_v28 = vld [vmem:[#allocation9 + $0xdc] ss:$12 sps:$4 sm:$0xff]   ;;  %v3002_v29 = vld [vmem:[#allocation9 + $0xd8] ss:$12 sps:$4 sm:$0xff]  }
 0x10c   :  { %541 = vmatprep.subr.bf16.mxu1 %v2979_v14  ;;  %v3016_v30 = vld [vmem:[#allocation12 + $0x8] ss:$20 sps:$4 sm:$0xff]   ;;  %v3018_v31 = vld [vmem:[#allocation12 + $0xc] ss:$20 sps:$4 sm:$0xff]   ;;  %v3022_v33 = vld [vmem:[#allocation12 + $0x30] ss:$20 sps:$4 sm:$0xff]  }
 0x10d   :  { %2578 = vmatmul.mubr.msk.bf16.vlgmr.msra.gmra.mrb[0].mxu0 %vm260_vm1, %v229_v13  ;;  %v3024_v32 = vld [vmem:[#allocation12 + $0x34] ss:$20 sps:$4 sm:$0xff]   ;;  %1377 = vmatprep.subr.bf16.mxu0 %v3018_v31  ;;  %v3030_v34 = vld [vmem:[#allocation12 + $0x5c] ss:$20 sps:$4 sm:$0xff]   ;;  %v3028_v35 = vld [vmem:[#allocation12 + $0x58] ss:$20 sps:$4 sm:$0xff]  }
 0x10e   :  { %1378 = vmatpush1.bf16.msra.mxu0 %v3016_v30  ;;  %v3036_v36 = vld [vmem:[#allocation12 + $0x84] ss:$20 sps:$4 sm:$0xff]   ;;  %v3034_v37 = vld [vmem:[#allocation12 + $0x80] ss:$20 sps:$4 sm:$0xff]   ;;  %v3040_v39 = vld [vmem:[#allocation12 + $0xa8] ss:$20 sps:$4 sm:$0xff]  }
 0x10f   :  { %542 = vmatpush1.bf16.msra.mxu1 %v2981_v15  ;;  %1379 = vmatprep.subr.bf16.mxu0 %v3024_v32  ;;  %v3042_v38 = vld [vmem:[#allocation12 + $0xac] ss:$20 sps:$4 sm:$0xff]   ;;  %v3048_v40 = vld [vmem:[#allocation12 + $0xd4] ss:$20 sps:$4 sm:$0xff]   ;;  %v3046_v41 = vld [vmem:[#allocation12 + $0xd0] ss:$20 sps:$4 sm:$0xff]  }
 0x110   :  { %543 = vmatprep.subr.bf16.mxu1 %v2982_v16  ;;  %v3054_v42 = vld [vmem:[#allocation12 + $0xfc] ss:$20 sps:$4 sm:$0xff]   ;;  %v3052_v43 = vld [vmem:[#allocation12 + $0xf8] ss:$20 sps:$4 sm:$0xff]   ;;  %v3058_v45 = vld [vmem:[#allocation12 + $0x120] ss:$20 sps:$4 sm:$0xff]  }
 0x111   :  { %v3060_v44 = vld [vmem:[#allocation12 + $0x124] ss:$20 sps:$4 sm:$0xff]   ;;  %v3066_v46 = vld [vmem:[#allocation12 + $0x14c] ss:$20 sps:$4 sm:$0xff]   ;;  %v3064_v47 = vld [vmem:[#allocation12 + $0x148] ss:$20 sps:$4 sm:$0xff]  }
 0x112   :  { %1380 = vmatpush1.bf16.msra.mxu0 %v3022_v33  ;;  %v3072_v48 = vld [vmem:[#allocation12 + $0x174] ss:$20 sps:$4 sm:$0xff]   ;;  %v3070_v49 = vld [vmem:[#allocation12 + $0x170] ss:$20 sps:$4 sm:$0xff]   ;;  %v3076_v51 = vld [vmem:[#allocation12 + $0x198] ss:$20 sps:$4 sm:$0xff]  }
 0x113   :  { %544 = vmatpush1.bf16.msra.mxu1 %v2984_v17  ;;  %1381 = vmatprep.subr.bf16.mxu0 %v3030_v34  ;;  %v3078_v50 = vld [vmem:[#allocation12 + $0x19c] ss:$20 sps:$4 sm:$0xff]   ;;  %v3084_v52 = vld [vmem:[#allocation12 + $0x1c4] ss:$20 sps:$4 sm:$0xff]   ;;  %v3082_v53 = vld [vmem:[#allocation12 + $0x1c0] ss:$20 sps:$4 sm:$0xff]  }
 0x114   :  { %545 = vmatprep.subr.bf16.mxu1 %v2985_v18  ;;  %v3090_v54 = vld [vmem:[#allocation12 + $0x1ec] ss:$20 sps:$4 sm:$0xff]   ;;  %v3088_v55 = vld [vmem:[#allocation12 + $0x1e8] ss:$20 sps:$4 sm:$0xff]   ;;  %v3094_v57 = vld [vmem:[#allocation12 + $0x210] ss:$20 sps:$4 sm:$0xff]  }
 0x115   :  { %v3096_v56 = vld [vmem:[#allocation12 + $0x214] ss:$20 sps:$4 sm:$0xff]   ;;  %v3938_v60 = vsub.s32 0, %v3935_v59  ;;  %v3941_v62 = vsub.s32 1, %v3935_v59  ;;  %vm533_vm2 = vcmask 261120   ;;  %vm1291_vm3 = vcmask 523264  }
 0x116   :  { %1382 = vmatpush1.bf16.msra.mxu0 %v3028_v35  ;;  %v233_v61 = vld [vmem:[#allocation8] sm:$0x3]  ;;  %v3003_v11 = vld [vmem:[#allocation9 + $0x8] ss:$12 sps:$4 sm:$0xff]   ;;  %v3004_v13 = vld [vmem:[#allocation9 + $0x20] ss:$12 sps:$4 sm:$0xff]  }
 0x117   :  { %546 = vmatpush1.bf16.msra.mxu1 %v2987_v19  ;;  %1383 = vmatprep.subr.bf16.mxu0 %v3036_v36  ;;  %v238_v63 = vrot.slane %v233_v61, %v3938_v60  ;;  %v242_v0 = vrot.slane %v233_v61, %v3941_v62  ;;  %v3005_v14 = vld [vmem:[#allocation9 + $0x38] ss:$12 sps:$4 sm:$0xff]   ;;  %v3006_v15 = vld [vmem:[#allocation9 + $0x50] ss:$12 sps:$4 sm:$0xff]   ;;  %v3007_v16 = vld [vmem:[#allocation9 + $0x68] ss:$12 sps:$4 sm:$0xff]  }
 0x118   :  { %547 = vmatprep.subr.bf16.mxu1 %v2988_v20  ;;  %v3008_v17 = vld [vmem:[#allocation9 + $0x80] ss:$12 sps:$4 sm:$0xff]   ;;  %v3009_v18 = vld [vmem:[#allocation9 + $0x98] ss:$12 sps:$4 sm:$0xff]   ;;  %v3010_v19 = vld [vmem:[#allocation9 + $0xb0] ss:$12 sps:$4 sm:$0xff]  }
 0x119   :  { %v3011_v20 = vld [vmem:[#allocation9 + $0xc8] ss:$12 sps:$4 sm:$0xff]   ;;  %v3039_v30 = vld [vmem:[#allocation12 + $0xa4] ss:$20 sps:$4 sm:$0xff]   ;;  %v3043_v33 = vld [vmem:[#allocation12 + $0xc8] ss:$20 sps:$4 sm:$0xff]  }
 0x11a   :  { %1384 = vmatpush1.bf16.msra.mxu0 %v3034_v37  ;;  %v3037_v31 = vld [vmem:[#allocation12 + $0xa0] ss:$20 sps:$4 sm:$0xff]   ;;  %v3049_v35 = vld [vmem:[#allocation12 + $0xf0] ss:$20 sps:$4 sm:$0xff]   ;;  %v3055_v37 = vld [vmem:[#allocation12 + $0x118] ss:$20 sps:$4 sm:$0xff]  }
 0x11b   :  { %548 = vmatpush1.bf16.msra.mxu1 %v2990_v21  ;;  %1385 = vmatprep.subr.bf16.mxu0 %v3042_v38  ;;  %v3012_v21 = vld [vmem:[#allocation9 + $0xe0] ss:$12 sps:$4 sm:$0xff]   ;;  %v3051_v34 = vld [vmem:[#allocation12 + $0xf4] ss:$20 sps:$4 sm:$0xff]   ;;  %v3057_v36 = vld [vmem:[#allocation12 + $0x11c] ss:$20 sps:$4 sm:$0xff]  }
 0x11c   :  { %549 = vmatprep.subr.bf16.mxu1 %v2991_v22  ;;  %v3015_v22 = vld [vmem:[#allocation12 + $0x4] ss:$20 sps:$4 sm:$0xff]   ;;  %v3045_v32 = vld [vmem:[#allocation12 + $0xcc] ss:$20 sps:$4 sm:$0xff]   ;;  %vm3673_vm4 = vmmov 0   ;;  %s3674_s13 = smov [#allocation26]  }
 0x11d   :  { %v3063_v38 = vld [vmem:[#allocation12 + $0x144] ss:$20 sps:$4 sm:$0xff]   ;;  %s2557_s27 = sshll.u32 %s3674_s13, 4  ;;  %vm2549_vm5 = vcmask 57344   ;;  %s2558_s27 = int_to_ptr.vmem [resolvable:$true] %s2557_s27 }
 0x11e   :  { %1386 = vmatpush1.bf16.msra.mxu0 %v3040_v39  ;;  %v3061_v39 = vld [vmem:[#allocation12 + $0x140] ss:$20 sps:$4 sm:$0xff]   ;;  %v3103_v58 = vld [vmem:[#allocation12 + $0x258] ss:$20 sps:$4 sm:$0xff]   ;;  %s3609_s8 = scalar_lea.vmem %s2558_s27, 16  ;;  %s3613_s1 = scalar_lea.vmem %s2558_s27, 32 }
 0x11f   :  { %550 = vmatpush1.bf16.msra.mxu1 %v2993_v23  ;;  %1387 = vmatprep.subr.bf16.mxu0 %v3048_v40  ;;  %v3013_v23 = vld [vmem:[#allocation12] ss:$20 sps:$4 sm:$0xff]   ;;  %v3111_v61 = vld [vmem:[#allocation12 + $0x284] ss:$20 sps:$4 sm:$0xff]   ;;  %p3610_p0 = scmp.ne.s32.totalorder %s2558_s27, %s3609_s8  ;;  %p3614_p1 = scmp.lt.s32.totalorder %s2558_s27, %s2558_s27 }
 0x120   :  { %551 = vmatprep.subr.bf16.mxu1 %v2994_v24  ;;  %v3021_v24 = vld [vmem:[#allocation12 + $0x2c] ss:$20 sps:$4 sm:$0xff]   ;;  %p3615_p2 = scmp.lt.s32.totalorder %s3613_s1, %s3609_s8 }
 0x121   :  { %v3069_v40 = vld [vmem:[#allocation12 + $0x16c] ss:$20 sps:$4 sm:$0xff]  }
 0x122   :  { %1388 = vmatpush1.bf16.msra.mxu0 %v3046_v41  ;;  %v3067_v41 = vld [vmem:[#allocation12 + $0x168] ss:$20 sps:$4 sm:$0xff]   ;;  %p3616_p3 = por %p3615_p2, %p3614_p1 }
 0x123   :  { %552 = vmatpush1.bf16.msra.mxu1 %v2996_v25  ;;  %1389 = vmatprep.subr.bf16.mxu0 %v3054_v42  ;;  %v3019_v25 = vld [vmem:[#allocation12 + $0x28] ss:$20 sps:$4 sm:$0xff]  }
 0x124   :  { %553 = vmatprep.subr.bf16.mxu1 %v2997_v26  ;;  %v3027_v26 = vld [vmem:[#allocation12 + $0x54] ss:$20 sps:$4 sm:$0xff]   ;;  %p3617_p4 = pnand %p3616_p3, %p3610_p0 }
 0x125   :  { %v3075_v42 = vld [vmem:[#allocation12 + $0x194] ss:$20 sps:$4 sm:$0xff]  }
 0x126   :  { %1390 = vmatpush1.bf16.msra.mxu0 %v3052_v43  ;;  %v3073_v43 = vld [vmem:[#allocation12 + $0x190] ss:$20 sps:$4 sm:$0xff]  }
 0x127   :  { %554 = vmatpush1.bf16.msra.mxu1 %v2999_v27  ;;  %1391 = vmatprep.subr.bf16.mxu0 %v3060_v44  ;;  %v3025_v27 = vld [vmem:[#allocation12 + $0x50] ss:$20 sps:$4 sm:$0xff]  }
 0x128   :  { %555 = vmatprep.subr.bf16.mxu1 %v3000_v28  ;;  %v3033_v28 = vld [vmem:[#allocation12 + $0x7c] ss:$20 sps:$4 sm:$0xff]  }
 0x129   :  { %v3081_v44 = vld [vmem:[#allocation12 + $0x1bc] ss:$20 sps:$4 sm:$0xff]  }
 0x12a   :  { %1392 = vmatpush1.bf16.msra.mxu0 %v3058_v45  ;;  %v3079_v45 = vld [vmem:[#allocation12 + $0x1b8] ss:$20 sps:$4 sm:$0xff]  }
 0x12b   :  { %556 = vmatpush1.bf16.msra.mxu1 %v3002_v29  ;;  %1393 = vmatprep.subr.bf16.mxu0 %v3066_v46  ;;  %v3031_v29 = vld [vmem:[#allocation12 + $0x78] ss:$20 sps:$4 sm:$0xff]  }
 0x12c   :  { %578 = vmatprep.subr.bf16.mxu1 %v3671_v1  ;;  %v3087_v46 = vld [vmem:[#allocation12 + $0x1e4] ss:$20 sps:$4 sm:$0xff]  }
 0x12e   :  { %1394 = vmatpush1.bf16.msra.mxu0 %v3064_v47  ;;  %v3102_v47 = vld [vmem:[#allocation12 + $0x23c] ss:$20 sps:$4 sm:$0xff]  }
 0x12f   :  { %1395 = vmatprep.subr.bf16.mxu0 %v3072_v48  ;;  %v3100_v48 = vld [vmem:[#allocation12 + $0x238] ss:$20 sps:$4 sm:$0xff]  }
 0x132   :  { %1396 = vmatpush1.bf16.msra.mxu0 %v3070_v49  ;;  %v3085_v49 = vld [vmem:[#allocation12 + $0x1e0] ss:$20 sps:$4 sm:$0xff]  }
 0x133   :  { %1397 = vmatprep.subr.bf16.mxu0 %v3078_v50  ;;  %v3093_v50 = vld [vmem:[#allocation12 + $0x20c] ss:$20 sps:$4 sm:$0xff]  }
 0x136   :  { %1398 = vmatpush1.bf16.msra.mxu0 %v3076_v51  ;;  %v3108_v51 = vld [vmem:[#allocation12 + $0x264] ss:$20 sps:$4 sm:$0xff]  }
 0x137   :  { %1399 = vmatprep.subr.bf16.mxu0 %v3084_v52  ;;  %v3106_v52 = vld [vmem:[#allocation12 + $0x260] ss:$20 sps:$4 sm:$0xff]  }
 0x13a   :  { %1400 = vmatpush1.bf16.msra.mxu0 %v3082_v53  ;;  %v3091_v53 = vld [vmem:[#allocation12 + $0x208] ss:$20 sps:$4 sm:$0xff]  }
 0x13b   :  { %1401 = vmatprep.subr.bf16.mxu0 %v3090_v54  ;;  %v3099_v54 = vld [vmem:[#allocation12 + $0x234] ss:$20 sps:$4 sm:$0xff]  }
 0x13e   :  { %1402 = vmatpush1.bf16.msra.mxu0 %v3088_v55  ;;  %v3097_v55 = vld [vmem:[#allocation12 + $0x230] ss:$20 sps:$4 sm:$0xff]  }
 0x13f   :  { %1403 = vmatprep.subr.bf16.mxu0 %v3096_v56  ;;  %v3114_v56 = vld [vmem:[#allocation12 + $0x28c] ss:$20 sps:$4 sm:$0xff]  }
 0x142   :  { %1404 = vmatpush1.bf16.msra.mxu0 %v3094_v57  ;;  %v3105_v57 = vld [vmem:[#allocation12 + $0x25c] ss:$20 sps:$4 sm:$0xff]  }
 0x143   :  { %1405 = vmatprep.subr.bf16.mxu0 %v3102_v47  ;;  %v3143_v47 = vld [vmem:[#allocation12 + $0x88] ss:$20 sps:$4 sm:$0xff]  }
 0x146   :  { %1406 = vmatpush1.bf16.msra.mxu0 %v3100_v48  ;;  %v3144_v48 = vld [vmem:[#allocation12 + $0x308] ss:$20 sps:$4 sm:$0xff]  }
 0x147   :  { %1407 = vmatprep.subr.bf16.mxu0 %v3108_v51  ;;  %v3146_v51 = vld [vmem:[#allocation12 + $0xb0] ss:$20 sps:$4 sm:$0xff]  }
 0x14a   :  { %1408 = vmatpush1.bf16.msra.mxu0 %v3106_v52  ;;  %v3153_v52 = vld [vmem:[#allocation15] ss:$8 sps:$4 sm:$0xff]  }
 0x14b   :  { %1418 = vmatprep.subr.bf16.mxu0 %v3114_v56  ;;  %v3156_v56 = vld [vmem:[#allocation15 + $0x10] ss:$8 sps:$4 sm:$0xff]  }
 0x1e0   :  { %v305_v2 = vpop.f32.mrb[0].mxu0 }
 0x1e1   :  { %v306_v3 = vadd.f32 %v305_v2, %v238_v63  ;;  %v307_v4 = vpop.f32.mrb[1].mxu0  ;;  %v356_v63 = vld [vmem:[#allocation11] sm:$0x7] }
 0x1e2   :  { %v308_v5 = vadd.f32 %v307_v4, %v242_v0  ;;  %v309_v6 = vpop.f32.mrb[2].mxu0  ;;  %v361_v0 = vrot.slane %v356_v63, %v3938_v60  ;;  %v365_v2 = vrot.slane %v356_v63, %v3941_v62 }
 0x1e3   :  { %v312_v7 = vmax.f32 %v306_v3, 0.0  ;;  %v310_v8 = vpop.f32.mrb[3].mxu0 }
 0x1e4   :  { %v313_v9 = vmax.f32 %v308_v5, 0.0 }
 0x1e5   :  { %v314_v12 = vpack.c.bf16 %v312_v7, %v312_v7 }
 0x1e6   :  { %v315_v10 = vpack.c.bf16 %v313_v9, %v313_v9 }
 0x1e8   :  { %2609 = vmatprep.mubr.msk.bf16.mxu1 %vm533_vm2, %v315_v10 }
 0x1e9   :  { %570 = vmatmul.mubr.bf16.vlgmr.msra.gmra.mrb[0].mxu1 %v314_v12 }
 0x1ea   :  { %579 = vmatpush1.bf16.msra.mxu1 %v3003_v11  ;;  %2610 = vmatprep.mubr.msk.bf16.mxu1 %vm533_vm2, %v315_v10 }
 0x1eb   :  { %580 = vmatprep.subr.bf16.mxu1 %v3671_v1 }
 0x1ee   :  { %581 = vmatpush1.bf16.msra.mxu1 %v3004_v13  ;;  %v3112_v13 = vld [vmem:[#allocation12 + $0x288] ss:$20 sps:$4 sm:$0xff]  }
 0x1ef   :  { %582 = vmatprep.subr.bf16.mxu1 %v3671_v1 }
 0x1f2   :  { %583 = vmatpush1.bf16.msra.mxu1 %v3005_v14 }
 0x1f3   :  { %584 = vmatprep.subr.bf16.mxu1 %v3671_v1 }
 0x1f6   :  { %585 = vmatpush1.bf16.msra.mxu1 %v3006_v15  ;;  %v3117_v15 = vld [vmem:[#allocation12 + $0x2ac] ss:$20 sps:$4 sm:$0xff]  }
 0x1f7   :  { %586 = vmatprep.subr.bf16.mxu1 %v3671_v1 }
 0x1fa   :  { %587 = vmatpush1.bf16.msra.mxu1 %v3007_v16  ;;  %v3120_v16 = vld [vmem:[#allocation12 + $0x2b4] ss:$20 sps:$4 sm:$0xff]  }
 0x1fb   :  { %588 = vmatprep.subr.bf16.mxu1 %v3671_v1 }
 0x1fe   :  { %589 = vmatpush1.bf16.msra.mxu1 %v3008_v17  ;;  %v3115_v17 = vld [vmem:[#allocation12 + $0x2a8] ss:$20 sps:$4 sm:$0xff]  }
 0x1ff   :  { %590 = vmatprep.subr.bf16.mxu1 %v3671_v1 }
 0x202   :  { %591 = vmatpush1.bf16.msra.mxu1 %v3009_v18  ;;  %v3118_v18 = vld [vmem:[#allocation12 + $0x2b0] ss:$20 sps:$4 sm:$0xff]  }
 0x203   :  { %592 = vmatprep.subr.bf16.mxu1 %v3671_v1 }
 0x206   :  { %593 = vmatpush1.bf16.msra.mxu1 %v3010_v19  ;;  %v3123_v19 = vld [vmem:[#allocation12 + $0x2d4] ss:$20 sps:$4 sm:$0xff]  }
 0x207   :  { %594 = vmatprep.subr.bf16.mxu1 %v3671_v1 }
 0x20a   :  { %595 = vmatpush1.bf16.msra.mxu1 %v3011_v20  ;;  %v3126_v20 = vld [vmem:[#allocation12 + $0x2dc] ss:$20 sps:$4 sm:$0xff]  }
 0x20b   :  { %596 = vmatprep.subr.bf16.mxu1 %v3671_v1 }
 0x20e   :  { %597 = vmatpush1.bf16.msra.mxu1 %v3012_v21  ;;  %v3121_v21 = vld [vmem:[#allocation12 + $0x2d0] ss:$20 sps:$4 sm:$0xff]  }
 0x20f   :  { %1295 = vmatprep.subr.bf16.mxu1 %v3015_v22  ;;  %v3124_v22 = vld [vmem:[#allocation12 + $0x2d8] ss:$20 sps:$4 sm:$0xff]  }
 0x211   :  { %611 = vmatmul.mubr.bf16.vlgmr.msra.gmra.mrb[4].mxu1 %v314_v12  ;;  %v3109_v12 = vld [vmem:[#allocation12 + $0x280] ss:$20 sps:$4 sm:$0xff]  }
 0x212   :  { %1296 = vmatpush1.bf16.msra.mxu1 %v3013_v23  ;;  %v3129_v23 = vld [vmem:[#allocation12 + $0x2fc] ss:$20 sps:$4 sm:$0xff]  }
 0x213   :  { %1297 = vmatprep.subr.bf16.mxu1 %v3021_v24  ;;  %v3132_v24 = vld [vmem:[#allocation12 + $0x304] ss:$20 sps:$4 sm:$0xff]  }
 0x216   :  { %1298 = vmatpush1.bf16.msra.mxu1 %v3019_v25  ;;  %v3127_v25 = vld [vmem:[#allocation12 + $0x2f8] ss:$20 sps:$4 sm:$0xff]  }
 0x217   :  { %1299 = vmatprep.subr.bf16.mxu1 %v3027_v26  ;;  %v3130_v26 = vld [vmem:[#allocation12 + $0x300] ss:$20 sps:$4 sm:$0xff]  }
 0x21a   :  { %1300 = vmatpush1.bf16.msra.mxu1 %v3025_v27  ;;  %v3133_v27 = vld [vmem:[#allocation12 + $0x150] ss:$20 sps:$4 sm:$0xff]  }
 0x21b   :  { %1301 = vmatprep.subr.bf16.mxu1 %v3033_v28  ;;  %v3672_v28 = vmov 0.0  }
 0x21e   :  { %1302 = vmatpush1.bf16.msra.mxu1 %v3031_v29  ;;  %v368_v29 = vsub.s32 2, %v3935_v59 }
 0x21f   :  { %1303 = vmatprep.subr.bf16.mxu1 %v3039_v30 }
 0x220   :  { %v369_v30 = vrot.slane %v356_v63, %v368_v29  ;;  %v3159_v63 = vld [vmem:[#allocation15 + $0x20] ss:$8 sps:$4 sm:$0xff]  }
 0x222   :  { %1304 = vmatpush1.bf16.msra.mxu1 %v3037_v31 }
 0x223   :  { %1305 = vmatprep.subr.bf16.mxu1 %v3045_v32 }
 0x226   :  { %1306 = vmatpush1.bf16.msra.mxu1 %v3043_v33 }
 0x227   :  { %1307 = vmatprep.subr.bf16.mxu1 %v3051_v34 }
 0x22a   :  { %1308 = vmatpush1.bf16.msra.mxu1 %v3049_v35 }
 0x22b   :  { %1309 = vmatprep.subr.bf16.mxu1 %v3057_v36 }
 0x22e   :  { %1310 = vmatpush1.bf16.msra.mxu1 %v3055_v37  ;;  %v3134_v37 = vld [vmem:[#allocation12 + $0x10] ss:$20 sps:$4 sm:$0xff]  }
 0x22f   :  { %1311 = vmatprep.subr.bf16.mxu1 %v3063_v38  ;;  %v3135_v38 = vld [vmem:[#allocation12 + $0x290] ss:$20 sps:$4 sm:$0xff]  }
 0x232   :  { %1312 = vmatpush1.bf16.msra.mxu1 %v3061_v39 }
 0x233   :  { %1313 = vmatprep.subr.bf16.mxu1 %v3069_v40  ;;  %v3136_v40 = vld [vmem:[#allocation12 + $0x178] ss:$20 sps:$4 sm:$0xff]  }
 0x236   :  { %1314 = vmatpush1.bf16.msra.mxu1 %v3067_v41  ;;  %v3137_v41 = vld [vmem:[#allocation12 + $0x38] ss:$20 sps:$4 sm:$0xff]  }
 0x237   :  { %1315 = vmatprep.subr.bf16.mxu1 %v3075_v42  ;;  %v3138_v42 = vld [vmem:[#allocation12 + $0x2b8] ss:$20 sps:$4 sm:$0xff]  }
 0x23a   :  { %1316 = vmatpush1.bf16.msra.mxu1 %v3073_v43  ;;  %v3139_v43 = vld [vmem:[#allocation12 + $0x1a0] ss:$20 sps:$4 sm:$0xff]  }
 0x23b   :  { %1317 = vmatprep.subr.bf16.mxu1 %v3081_v44  ;;  %v3140_v44 = vld [vmem:[#allocation12 + $0x60] ss:$20 sps:$4 sm:$0xff]  }
 0x23e   :  { %1318 = vmatpush1.bf16.msra.mxu1 %v3079_v45  ;;  %v3141_v45 = vld [vmem:[#allocation12 + $0x2e0] ss:$20 sps:$4 sm:$0xff]  }
 0x23f   :  { %1319 = vmatprep.subr.bf16.mxu1 %v3087_v46  ;;  %v3142_v46 = vld [vmem:[#allocation12 + $0x1c8] ss:$20 sps:$4 sm:$0xff]  }
 0x242   :  { %1320 = vmatpush1.bf16.msra.mxu1 %v3085_v49  ;;  %v3145_v49 = vld [vmem:[#allocation12 + $0x1f0] ss:$20 sps:$4 sm:$0xff]  }
 0x243   :  { %1321 = vmatprep.subr.bf16.mxu1 %v3093_v50  ;;  %v3155_v50 = vld [vmem:[#allocation15 + $0x4] ss:$8 sps:$4 sm:$0xff]  }
 0x246   :  { %1322 = vmatpush1.bf16.msra.mxu1 %v3091_v53  ;;  %v3147_v53 = vld [vmem:[#allocation12 + $0x218] ss:$20 sps:$4 sm:$0xff]  }
 0x247   :  { %1323 = vmatprep.subr.bf16.mxu1 %v3099_v54  ;;  %v3158_v54 = vld [vmem:[#allocation15 + $0x14] ss:$8 sps:$4 sm:$0xff]  }
 0x24a   :  { %1324 = vmatpush1.bf16.msra.mxu1 %v3097_v55  ;;  %v3148_v55 = vld [vmem:[#allocation12 + $0xd8] ss:$20 sps:$4 sm:$0xff]  }
 0x24b   :  { %1325 = vmatprep.subr.bf16.mxu1 %v3105_v57  ;;  %v3149_v57 = vld [vmem:[#allocation12 + $0x240] ss:$20 sps:$4 sm:$0xff]  }
 0x24e   :  { %1326 = vmatpush1.bf16.msra.mxu1 %v3103_v58  ;;  %v3161_v58 = vld [vmem:[#allocation15 + $0x24] ss:$8 sps:$4 sm:$0xff]  }
 0x24f   :  { %1336 = vmatprep.subr.bf16.mxu1 %v3111_v61  ;;  %v3150_v61 = vld [vmem:[#allocation12 + $0x100] ss:$20 sps:$4 sm:$0xff]  }
 0x2bc   :  { %v571_v3 = vpop.f32.mrb[0].mxu1 }
 0x2bd   :  { %v572_v4 = vadd.f32 %v571_v3, %v361_v0  ;;  %v573_v5 = vpop.f32.mrb[1].mxu1  ;;  %v3151_v0 = vld [vmem:[#allocation12 + $0x268] ss:$20 sps:$4 sm:$0xff]  }
 0x2be   :  { %v574_v6 = vadd.f32 %v573_v5, %v365_v2  ;;  %v575_v7 = vpop.f32.mrb[2].mxu1  ;;  %v3164_v2 = vld [vmem:[#allocation15 + $0x34] ss:$8 sps:$4 sm:$0xff]   ;;  %v3167_v5 = vld [vmem:[#allocation15 + $0x44] ss:$8 sps:$4 sm:$0xff]  }
 0x2bf   :  { %v618_v8 = vmax.f32 %v572_v4, 0.0  ;;  %v576_v9 = vpop.f32.mrb[3].mxu1  ;;  %v3152_v3 = vld [vmem:[#allocation12 + $0x128] ss:$20 sps:$4 sm:$0xff]  }
 0x2c0   :  { %v619_v10 = vmax.f32 %v574_v6, 0.0  ;;  %v3162_v4 = vld [vmem:[#allocation15 + $0x30] ss:$8 sps:$4 sm:$0xff]   ;;  %v3165_v6 = vld [vmem:[#allocation15 + $0x40] ss:$8 sps:$4 sm:$0xff]  }
 0x2c1   :  { %v3956_v14 = vpack.c.bf16 %v618_v8, %v618_v8  ;;  %v3170_v7 = vld [vmem:[#allocation15 + $0x54] ss:$8 sps:$4 sm:$0xff]   ;;  %v3168_v8 = vld [vmem:[#allocation15 + $0x50] ss:$8 sps:$4 sm:$0xff]   ;;  %v3173_v9 = vld [vmem:[#allocation15 + $0x64] ss:$8 sps:$4 sm:$0xff]  }
 0x2c2   :  { %v622_v11 = vpack.c.bf16 %v619_v10, %v619_v10  ;;  %v3171_v10 = vld [vmem:[#allocation15 + $0x60] ss:$8 sps:$4 sm:$0xff]  }
 0x2c4   :  { %1327 = vmatprep.mubr.bf16.mxu1 %v622_v11  ;;  %1409 = vmatprep.mubr.bf16.mxu0 %v622_v11 }
 0x2c5   :  { %1328 = vmatmul.mubr.bf16.vlgmr.msra.gmra.mrb[8].mxu1 %v3956_v14  ;;  %1410 = vmatmul.mubr.bf16.vlgmr.msra.gmra.mrb[4].mxu0 %v3956_v14 }
 0x2c6   :  { %1337 = vmatpush1.bf16.msra.mxu1 %v3109_v12  ;;  %1419 = vmatpush1.bf16.msra.mxu0 %v3112_v13  ;;  %v3174_v12 = vld [vmem:[#allocation15 + $0x70] ss:$8 sps:$4 sm:$0xff]   ;;  %v3179_v13 = vld [vmem:[#allocation15 + $0x84] ss:$8 sps:$4 sm:$0xff]  }
 0x2c7   :  { %1338 = vmatprep.subr.bf16.mxu1 %v3117_v15  ;;  %1420 = vmatprep.subr.bf16.mxu0 %v3120_v16  ;;  %v3177_v15 = vld [vmem:[#allocation15 + $0x80] ss:$8 sps:$4 sm:$0xff]   ;;  %v3182_v16 = vld [vmem:[#allocation15 + $0x94] ss:$8 sps:$4 sm:$0xff]  }
 0x2c8   :  { %1368 = vmatprep.mubr.bf16.mxu1 %v3671_v1  ;;  %1450 = vmatprep.mubr.bf16.mxu0 %v3671_v1 }
 0x2ca   :  { %1339 = vmatpush1.bf16.msra.mxu1 %v3115_v17  ;;  %1421 = vmatpush1.bf16.msra.mxu0 %v3118_v18  ;;  %v3180_v17 = vld [vmem:[#allocation15 + $0x90] ss:$8 sps:$4 sm:$0xff]   ;;  %v3183_v18 = vld [vmem:[#allocation15 + $0xa0] ss:$8 sps:$4 sm:$0xff]  }
 0x2cb   :  { %1340 = vmatprep.subr.bf16.mxu1 %v3123_v19  ;;  %1422 = vmatprep.subr.bf16.mxu0 %v3126_v20  ;;  %v3188_v19 = vld [vmem:[#allocation15 + $0xb4] ss:$8 sps:$4 sm:$0xff]   ;;  %v3186_v20 = vld [vmem:[#allocation15 + $0xb0] ss:$8 sps:$4 sm:$0xff]  }
 0x2ce   :  { %1341 = vmatpush1.bf16.msra.mxu1 %v3121_v21  ;;  %1423 = vmatpush1.bf16.msra.mxu0 %v3124_v22  ;;  %v3191_v21 = vld [vmem:[#allocation15 + $0xc4] ss:$8 sps:$4 sm:$0xff]   ;;  %v3189_v22 = vld [vmem:[#allocation15 + $0xc0] ss:$8 sps:$4 sm:$0xff]  }
 0x2cf   :  { %1342 = vmatprep.subr.bf16.mxu1 %v3129_v23  ;;  %1424 = vmatprep.subr.bf16.mxu0 %v3132_v24  ;;  %v3194_v23 = vld [vmem:[#allocation15 + $0xd4] ss:$8 sps:$4 sm:$0xff]   ;;  %v3192_v24 = vld [vmem:[#allocation15 + $0xd0] ss:$8 sps:$4 sm:$0xff]  }
 0x2d2   :  { %1343 = vmatpush1.bf16.msra.mxu1 %v3127_v25  ;;  %1425 = vmatpush1.bf16.msra.mxu0 %v3130_v26  ;;  %v3197_v25 = vld [vmem:[#allocation15 + $0xe4] ss:$8 sps:$4 sm:$0xff]   ;;  %v3195_v26 = vld [vmem:[#allocation15 + $0xe0] ss:$8 sps:$4 sm:$0xff]  }
 0x2d3   :  { %2822 = vmatprep.subr.bf16.mxu1 %v3133_v27  ;;  %2882 = vmatprep.subr.bf16.mxu0 %v3672_v28  ;;  %v3200_v27 = vld [vmem:[#allocation15 + $0xf4] ss:$8 sps:$4 sm:$0xff]  }
 0x2e4   :  { %v612_v31 = vpop.f32.mrb[4].mxu1 }
 0x2e5   :  { %v613_v32 = vadd.f32 %v612_v31, %v369_v30  ;;  %v614_v33 = vpop.f32.mrb[5].mxu1  ;;  %v3198_v30 = vld [vmem:[#allocation15 + $0xf0] ss:$8 sps:$4 sm:$0xff]   ;;  %v3203_v31 = vld [vmem:[#allocation15 + $0x104] ss:$8 sps:$4 sm:$0xff]  }
 0x2e6   :  { %v615_v34 = vpop.f32.mrb[6].mxu1  ;;  %v3274_v33 = vld [vmem:[#allocation18] sm:$0xff]  }
 0x2e7   :  { %v620_v35 = vmax.f32 %v613_v32, 0.0  ;;  %v616_v36 = vpop.f32.mrb[7].mxu1  ;;  %v3273_v32 = vld [vmem:[#allocation18 + $0x40] sm:$0xff]   ;;  %v3275_v34 = vld [vmem:[#allocation18 + $0x48] sm:$0xff]  }
 0x2e8   :  { %v3277_v36 = vld [vmem:[#allocation18 + $0x50] sm:$0xff]  }
 0x2e9   :  { %v623_v39 = vpack.c.bf16 %v620_v35, %v620_v35  ;;  %v3276_v35 = vld [vmem:[#allocation18 + $0x8] sm:$0xff]  }
 0x2eb   :  { %2711 = vmatmul.mubr.msk.bf16.vlgmr.msra.gmra.mrb[8].mxu1 %vm1291_vm3, %v623_v39  ;;  %2712 = vmatmul.mubr.msk.bf16.vlgmr.msra.gmra.mrb[4].mxu0 %vm1291_vm3, %v623_v39 }
 0x2ec   :  { %2823 = vmatpush3.bf16.msra.mxu1 %v3134_v37  ;;  %2883 = vmatpush3.bf16.msra.mxu0 %v3135_v38  ;;  %v3278_v37 = vld [vmem:[#allocation18 + $0x10] sm:$0xff]   ;;  %v3279_v38 = vld [vmem:[#allocation18 + $0x58] sm:$0xff]  }
 0x2ed   :  { %1491 = vmatprep.mubr.bf16.mxu1 %v622_v11  ;;  %2824 = vmatprep.subr.bf16.mxu1 %v3136_v40  ;;  %v3176_v11 = vld [vmem:[#allocation15 + $0x74] ss:$8 sps:$4 sm:$0xff]   ;;  %v3281_v40 = vld [vmem:[#allocation18 + $0x60] sm:$0xff]  }
 0x2ee   :  { %2884 = vmatprep.subr.bf16.mxu0 %v3672_v28  ;;  %2890 = vmatprep.mubr.msk.bf16.mxu0 %vm3673_vm4, %v3672_v28 }
 0x2f0   :  { %2825 = vmatpush3.bf16.msra.mxu1 %v3137_v41  ;;  %2885 = vmatpush3.bf16.msra.mxu0 %v3138_v42  ;;  %v3282_v41 = vld [vmem:[#allocation18 + $0x20] sm:$0xff]   ;;  %v3283_v42 = vld [vmem:[#allocation18 + $0x68] sm:$0xff]  }
 0x2f1   :  { %2826 = vmatprep.subr.bf16.mxu1 %v3139_v43  ;;  %2886 = vmatprep.subr.bf16.mxu0 %v3672_v28  ;;  %v3975_v43 = vld [vmem:[#allocation14] sm:$0x1f] }
 0x2f4   :  { %2827 = vmatpush3.bf16.msra.mxu1 %v3140_v44  ;;  %2887 = vmatpush3.bf16.msra.mxu0 %v3141_v45  ;;  %v760_v44 = vsub.s32 3, %v3935_v59  ;;  %v3284_v45 = vld [vmem:[#allocation18 + $0x28] sm:$0xff]  }
 0x2f5   :  { %2828 = vmatprep.subr.bf16.mxu1 %v3142_v46  ;;  %2888 = vmatprep.subr.bf16.mxu0 %v3672_v28  ;;  %v749_v46 = vrot.slane %v3975_v43, %v3938_v60 }
 0x2f8   :  { %2829 = vmatpush3.bf16.msra.mxu1 %v3143_v47  ;;  %2889 = vmatpush3.bf16.msra.mxu0 %v3144_v48  ;;  %v753_v47 = vrot.slane %v3975_v43, %v3941_v62  ;;  %v761_v48 = vrot.slane %v3975_v43, %v760_v44  ;;  %v3234_v44 = vld [vmem:[#allocation15 + $0x1b0] ss:$8 sps:$4 sm:$0xff]  }
 0x2f9   :  { %2830 = vmatprep.subr.bf16.mxu1 %v3145_v49  ;;  %2041 = vmatprep.subr.bf16.mxu0 %v3155_v50 }
 0x2fb   :  { %2891 = vmatmul.mubr.msk.bf16.vlgmr.msra.gmra.mrb[8].mxu0 %vm1291_vm3, %v623_v39  ;;  %v3280_v39 = vld [vmem:[#allocation18 + $0x18] sm:$0xff]  }
 0x2fc   :  { %2831 = vmatpush3.bf16.msra.mxu1 %v3146_v51  ;;  %2042 = vmatpush1.bf16.msra.mxu0 %v3153_v52 }
 0x2fd   :  { %2832 = vmatprep.subr.bf16.mxu1 %v3147_v53  ;;  %2043 = vmatprep.subr.bf16.mxu0 %v3158_v54 }
 0x300   :  { %2833 = vmatpush3.bf16.msra.mxu1 %v3148_v55  ;;  %2044 = vmatpush1.bf16.msra.mxu0 %v3156_v56 }
 0x301   :  { %2834 = vmatprep.subr.bf16.mxu1 %v3149_v57  ;;  %2045 = vmatprep.subr.bf16.mxu0 %v3161_v58 }
 0x304   :  { %2835 = vmatpush3.bf16.msra.mxu1 %v3150_v61  ;;  %2046 = vmatpush1.bf16.msra.mxu0 %v3159_v63 }
 0x305   :  { %2836 = vmatprep.subr.bf16.mxu1 %v3151_v0  ;;  %2047 = vmatprep.subr.bf16.mxu0 %v3164_v2 }
 0x308   :  { %2837 = vmatpush3.bf16.msra.mxu1 %v3152_v3  ;;  %2048 = vmatpush1.bf16.msra.mxu0 %v3162_v4  ;;  %v3201_v4 = vld [vmem:[#allocation15 + $0x100] ss:$8 sps:$4 sm:$0xff]  }
 0x309   :  { %2049 = vmatprep.subr.bf16.mxu0 %v3167_v5  ;;  %2849 = vmatprep.subr.bf16.mxu1 %v3273_v32  ;;  %v3222_v32 = vld [vmem:[#allocation15 + $0x170] ss:$8 sps:$4 sm:$0xff]  }
 0x30b   :  { %1492 = vmatmul.mubr.bf16.vlgmr.msra.gmra.mrb[12].mxu1 %v3956_v14  ;;  %v3185_v14 = vld [vmem:[#allocation15 + $0xa4] ss:$8 sps:$4 sm:$0xff]  }
 0x30c   :  { %2050 = vmatpush1.bf16.msra.mxu0 %v3165_v6  ;;  %2850 = vmatpush3.bf16.msra.mxu1 %v3274_v33  ;;  %v3206_v6 = vld [vmem:[#allocation15 + $0x114] ss:$8 sps:$4 sm:$0xff]  }
 0x30d   :  { %2051 = vmatprep.subr.bf16.mxu0 %v3170_v7  ;;  %2851 = vmatprep.subr.bf16.mxu1 %v3275_v34  ;;  %v3227_v34 = vld [vmem:[#allocation15 + $0x184] ss:$8 sps:$4 sm:$0xff]  }
 0x310   :  { %2052 = vmatpush1.bf16.msra.mxu0 %v3168_v8  ;;  %2852 = vmatpush3.bf16.msra.mxu1 %v3276_v35  ;;  %v3204_v8 = vld [vmem:[#allocation15 + $0x110] ss:$8 sps:$4 sm:$0xff]  }
 0x311   :  { %2053 = vmatprep.subr.bf16.mxu0 %v3173_v9  ;;  %2853 = vmatprep.subr.bf16.mxu1 %v3277_v36  ;;  %v3209_v9 = vld [vmem:[#allocation15 + $0x124] ss:$8 sps:$4 sm:$0xff]  }
 0x314   :  { %2054 = vmatpush1.bf16.msra.mxu0 %v3171_v10  ;;  %2854 = vmatpush3.bf16.msra.mxu1 %v3278_v37  ;;  %v3207_v10 = vld [vmem:[#allocation15 + $0x120] ss:$8 sps:$4 sm:$0xff]  }
 0x315   :  { %2055 = vmatprep.subr.bf16.mxu0 %v3176_v11  ;;  %2855 = vmatprep.subr.bf16.mxu1 %v3279_v38  ;;  %v3212_v11 = vld [vmem:[#allocation15 + $0x134] ss:$8 sps:$4 sm:$0xff]   ;;  %v3225_v37 = vld [vmem:[#allocation15 + $0x180] ss:$8 sps:$4 sm:$0xff]  }
 0x316   :  { %v3230_v38 = vld [vmem:[#allocation15 + $0x194] ss:$8 sps:$4 sm:$0xff]  }
 0x318   :  { %2056 = vmatpush1.bf16.msra.mxu0 %v3174_v12  ;;  %2856 = vmatpush3.bf16.msra.mxu1 %v3280_v39  ;;  %v3228_v39 = vld [vmem:[#allocation15 + $0x190] ss:$8 sps:$4 sm:$0xff]  }
 0x319   :  { %2057 = vmatprep.subr.bf16.mxu0 %v3179_v13  ;;  %2857 = vmatprep.subr.bf16.mxu1 %v3281_v40  ;;  %v3233_v40 = vld [vmem:[#allocation15 + $0x1a4] ss:$8 sps:$4 sm:$0xff]  }
 0x31c   :  { %2058 = vmatpush1.bf16.msra.mxu0 %v3177_v15  ;;  %2858 = vmatpush3.bf16.msra.mxu1 %v3282_v41  ;;  %v3231_v41 = vld [vmem:[#allocation15 + $0x1a0] ss:$8 sps:$4 sm:$0xff]  }
 0x31d   :  { %2059 = vmatprep.subr.bf16.mxu0 %v3182_v16  ;;  %2859 = vmatprep.subr.bf16.mxu1 %v3283_v42  ;;  %v3210_v16 = vld [vmem:[#allocation15 + $0x130] ss:$8 sps:$4 sm:$0xff]   ;;  %v3236_v42 = vld [vmem:[#allocation15 + $0x1b4] ss:$8 sps:$4 sm:$0xff]  }
 0x320   :  { %2060 = vmatpush1.bf16.msra.mxu0 %v3180_v17  ;;  %2860 = vmatpush3.bf16.msra.mxu1 %v3284_v45  ;;  %v3239_v45 = vld [vmem:[#allocation15 + $0x1c4] ss:$8 sps:$4 sm:$0xff]  }
 0x321   :  { %2061 = vmatprep.subr.bf16.mxu0 %v3185_v14  ;;  %v3215_v14 = vld [vmem:[#allocation15 + $0x144] ss:$8 sps:$4 sm:$0xff]  }
 0x324   :  { %2062 = vmatpush1.bf16.msra.mxu0 %v3183_v18  ;;  %v3213_v18 = vld [vmem:[#allocation15 + $0x140] ss:$8 sps:$4 sm:$0xff]  }
 0x325   :  { %2063 = vmatprep.subr.bf16.mxu0 %v3188_v19  ;;  %v3218_v19 = vld [vmem:[#allocation15 + $0x154] ss:$8 sps:$4 sm:$0xff]  }
 0x328   :  { %2064 = vmatpush1.bf16.msra.mxu0 %v3186_v20  ;;  %v3216_v20 = vld [vmem:[#allocation15 + $0x150] ss:$8 sps:$4 sm:$0xff]  }
 0x329   :  { %2065 = vmatprep.subr.bf16.mxu0 %v3191_v21  ;;  %v3221_v21 = vld [vmem:[#allocation15 + $0x164] ss:$8 sps:$4 sm:$0xff]  }
 0x32c   :  { %2066 = vmatpush1.bf16.msra.mxu0 %v3189_v22  ;;  %v764_v22 = vsub.s32 4, %v3935_v59  ;;  %v3254_v59 = vld [vmem:[#allocation15 + $0x214] ss:$8 sps:$4 sm:$0xff]  }
 0x32d   :  { %2067 = vmatprep.subr.bf16.mxu0 %v3194_v23  ;;  %v3219_v23 = vld [vmem:[#allocation15 + $0x160] ss:$8 sps:$4 sm:$0xff]  }
 0x330   :  { %2068 = vmatpush1.bf16.msra.mxu0 %v3192_v24  ;;  %v3224_v24 = vld [vmem:[#allocation15 + $0x174] ss:$8 sps:$4 sm:$0xff]  }
 0x331   :  { %2069 = vmatprep.subr.bf16.mxu0 %v3197_v25 }
 0x334   :  { %2070 = vmatpush1.bf16.msra.mxu0 %v3195_v26  ;;  %v765_v26 = vrot.slane %v3975_v43, %v764_v22 }
 0x335   :  { %2071 = vmatprep.subr.bf16.mxu0 %v3200_v27 }
 0x338   :  { %2072 = vmatpush1.bf16.msra.mxu0 %v3198_v30 }
 0x339   :  { %2082 = vmatprep.subr.bf16.mxu0 %v3203_v31 }
 0x3be   :  { %v1370_v49 = vpop.f32.mrb[8].mxu1  ;;  %v3983_v50 = vpop.f32.mrb[4].mxu0 }
 0x3bf   :  { %v2919_v51 = vadd.f32 %v1370_v49, %v749_v46  ;;  %v1372_v52 = vpop.f32.mrb[9].mxu1  ;;  %v1454_v53 = vpop.f32.mrb[5].mxu0  ;;  %v3237_v46 = vld [vmem:[#allocation15 + $0x1c0] ss:$8 sps:$4 sm:$0xff]   ;;  %v757_v49 = vrot.slane %v3975_v43, %v368_v29  ;;  %v3252_v29 = vld [vmem:[#allocation15 + $0x210] ss:$8 sps:$4 sm:$0xff]  }
 0x3c0   :  { %v2920_v54 = vadd.f32 %v1372_v52, %v753_v47  ;;  %v2922_v55 = vadd.f32 %v1454_v53, %v761_v48  ;;  %v1374_v56 = vpop.f32.mrb[10].mxu1  ;;  %v1456_v57 = vpop.f32.mrb[6].mxu0  ;;  %v3242_v47 = vld [vmem:[#allocation15 + $0x1d4] ss:$8 sps:$4 sm:$0xff]   ;;  %v3240_v48 = vld [vmem:[#allocation15 + $0x1d0] ss:$8 sps:$4 sm:$0xff]  }
 0x3c1   :  { %v1539_v58 = vmax.f32 %v2919_v51, 0.0  ;;  %v1375_v61 = vpop.f32.mrb[11].mxu1  ;;  %v1457_v63 = vpop.f32.mrb[7].mxu0  ;;  %v3245_v51 = vld [vmem:[#allocation15 + $0x1e4] ss:$8 sps:$4 sm:$0xff]   ;;  %v2921_v53 = vadd.f32 %v3983_v50, %v757_v49 }
 0x3c2   :  { %v1540_v0 = vmax.f32 %v2920_v54, 0.0  ;;  %v1542_v2 = vmax.f32 %v2922_v55, 0.0  ;;  %v3243_v52 = vld [vmem:[#allocation15 + $0x1e0] ss:$8 sps:$4 sm:$0xff]   ;;  %v3248_v54 = vld [vmem:[#allocation15 + $0x1f4] ss:$8 sps:$4 sm:$0xff]  }
 0x3c3   :  { %v1544_v5 = vpack.c.bf16 %v1539_v58, %v1539_v58  ;;  %v3246_v55 = vld [vmem:[#allocation15 + $0x1f0] ss:$8 sps:$4 sm:$0xff]   ;;  %v1541_v56 = vmax.f32 %v2921_v53, 0.0  ;;  %v3251_v57 = vld [vmem:[#allocation15 + $0x204] ss:$8 sps:$4 sm:$0xff]  }
 0x3c4   :  { %v1545_v3 = vpack.c.bf16 %v1540_v0, %v1540_v0  ;;  %v1547_v7 = vpack.c.bf16 %v1542_v2, %v1542_v2  ;;  %v3249_v58 = vld [vmem:[#allocation15 + $0x200] ss:$8 sps:$4 sm:$0xff]   ;;  %v3257_v43 = vld [vmem:[#allocation15 + $0x224] ss:$8 sps:$4 sm:$0xff]   ;;  %v3260_v63 = vld [vmem:[#allocation15 + $0x234] ss:$8 sps:$4 sm:$0xff]  }
 0x3c5   :  { %v1546_v61 = vpack.c.bf16 %v1541_v56, %v1541_v56  ;;  %v3255_v50 = vld [vmem:[#allocation15 + $0x220] ss:$8 sps:$4 sm:$0xff]   ;;  %v3258_v0 = vld [vmem:[#allocation15 + $0x230] ss:$8 sps:$4 sm:$0xff]   ;;  %v3263_v2 = vld [vmem:[#allocation15 + $0x244] ss:$8 sps:$4 sm:$0xff]  }
 0x3c6   :  { %2073 = vmatprep.mubr.bf16.mxu0 %v1545_v3  ;;  %v3261_v3 = vld [vmem:[#allocation15 + $0x240] ss:$8 sps:$4 sm:$0xff]  }
 0x3c7   :  { %2074 = vmatmul.mubr.bf16.vlgmr.msra.gmra.mrb[12].mxu0 %v1544_v5  ;;  %v3264_v5 = vld [vmem:[#allocation15 + $0x250] ss:$8 sps:$4 sm:$0xff]  }
 0x3c8   :  { %2083 = vmatpush1.bf16.msra.mxu0 %v3201_v4  ;;  %2114 = vmatprep.mubr.bf16.mxu0 %v1547_v7  ;;  %v3266_v4 = vld [vmem:[#allocation15 + $0x254] ss:$8 sps:$4 sm:$0xff]  }
 0x3c9   :  { %2084 = vmatprep.subr.bf16.mxu0 %v3206_v6  ;;  %v3269_v6 = vld [vmem:[#allocation15 + $0x264] ss:$8 sps:$4 sm:$0xff]   ;;  %v3272_v7 = vld [vmem:[#allocation15 + $0x274] ss:$8 sps:$4 sm:$0xff]  }
 0x3cc   :  { %2085 = vmatpush1.bf16.msra.mxu0 %v3204_v8  ;;  %v3270_v8 = vld [vmem:[#allocation15 + $0x270] ss:$8 sps:$4 sm:$0xff]  }
 0x3cd   :  { %2086 = vmatprep.subr.bf16.mxu0 %v3209_v9 }
 0x3ce   :  { %v1533_v12 = vpop.f32.mrb[8].mxu0 }
 0x3cf   :  { %v2892_v13 = vpop.f32.mrb[9].mxu0 }
 0x3d0   :  { %v1536_v15 = vpop.f32.mrb[10].mxu0  ;;  %2087 = vmatpush1.bf16.msra.mxu0 %v3207_v10  ;;  %v3287_v13 = vld [vmem:[#allocation18 + $0x78] sm:$0xff]  }
 0x3d1   :  { %v2893_v17 = vpop.f32.mrb[11].mxu0  ;;  %2088 = vmatprep.subr.bf16.mxu0 %v3212_v11  ;;  %v3285_v11 = vld [vmem:[#allocation18 + $0x70] sm:$0xff]   ;;  %v3288_v15 = vld [vmem:[#allocation18 + $0x38] sm:$0xff]  }
 0x3d2   :  { %2861 = vmatprep.subr.bf16.mxu1 %v3285_v11 }
 0x3d4   :  { %2089 = vmatpush1.bf16.msra.mxu0 %v3210_v16  ;;  %v1629_v16 = vld [vmem:[#allocation17] sm:$0x3] }
 0x3d5   :  { %2090 = vmatprep.subr.bf16.mxu0 %v3215_v14  ;;  %v1634_v17 = vrot.slane %v1629_v16, %v3938_v60  ;;  %v1638_v14 = vrot.slane %v1629_v16, %v3941_v62  ;;  %v3291_v62 = vld [vmem:[#allocation21 + $0x10] sm:$0xff]  }
 0x3d8   :  { %2091 = vmatpush1.bf16.msra.mxu0 %v3213_v18 }
 0x3d9   :  { %2092 = vmatprep.subr.bf16.mxu0 %v3218_v19 }
 0x3dc   :  { %2093 = vmatpush1.bf16.msra.mxu0 %v3216_v20 }
 0x3dd   :  { %2094 = vmatprep.subr.bf16.mxu0 %v3221_v21 }
 0x3de   :  { %v2838_v25 = vpop.f32.mrb[12].mxu1 }
 0x3df   :  { %v2839_v27 = vpop.f32.mrb[13].mxu1 }
 0x3e0   :  { %v2840_v30 = vadd.f32 %v2839_v27, %v2838_v25  ;;  %v2841_v31 = vpop.f32.mrb[14].mxu1  ;;  %2095 = vmatpush1.bf16.msra.mxu0 %v3219_v23  ;;  %v3289_v27 = vld [vmem:[#allocation21] sm:$0xff]  }
 0x3e1   :  { %v2842_v33 = vpop.f32.mrb[15].mxu1  ;;  %2096 = vmatprep.subr.bf16.mxu0 %v3224_v24  ;;  %v3290_v31 = vld [vmem:[#allocation21 + $0x8] sm:$0xff]  }
 0x3e2   :  { %v1494_v35 = vadd.f32 %v2840_v30, %v765_v26  ;;  %v3293_v33 = vld [vmem:[#allocation21 + $0x20] sm:$0xff]  }
 0x3e4   :  { %v3987_v36 = vadd.f32 %v1533_v12, %v1494_v35  ;;  %2097 = vmatpush1.bf16.msra.mxu0 %v3222_v32  ;;  %v3286_v12 = vld [vmem:[#allocation18 + $0x30] sm:$0xff]   ;;  %v3292_v32 = vld [vmem:[#allocation21 + $0x18] sm:$0xff]  }
 0x3e5   :  { %2098 = vmatprep.subr.bf16.mxu0 %v3227_v34  ;;  %2862 = vmatpush3.bf16.msra.mxu1 %v3286_v12  ;;  %v3294_v34 = vld [vmem:[#allocation21 + $0x28] sm:$0xff]   ;;  %v3295_v35 = vld [vmem:[#allocation21 + $0x30] sm:$0xff]  }
 0x3e6   :  { %v1543_v9 = vmax.f32 %v3987_v36, 0.0  ;;  %2863 = vmatprep.subr.bf16.mxu1 %v3287_v13  ;;  %v3296_v36 = vld [vmem:[#allocation21 + $0x38] sm:$0xff]  }
 0x3e8   :  { %2099 = vmatpush1.bf16.msra.mxu0 %v3225_v37  ;;  %v1548_v10 = vpack.c.bf16 %v1543_v9, %v1543_v9 }
 0x3e9   :  { %2100 = vmatprep.subr.bf16.mxu0 %v3230_v38  ;;  %2864 = vmatpush3.bf16.msra.mxu1 %v3288_v15  ;;  %v2794_v38 = vld [vmem:[#allocation20] ss:$0 sm:$0xff] }
 0x3ea   :  { %2894 = vmatprep.subr.bf16.mxu1 %v3672_v28 }
 0x3ec   :  { %2101 = vmatpush1.bf16.msra.mxu0 %v3228_v39 }
 0x3ed   :  { %2102 = vmatprep.subr.bf16.mxu0 %v3233_v40 }
 0x3f0   :  { %2103 = vmatpush1.bf16.msra.mxu0 %v3231_v41 }
 0x3f1   :  { %2104 = vmatprep.subr.bf16.mxu0 %v3236_v42 }
 0x3f4   :  { %2105 = vmatpush1.bf16.msra.mxu0 %v3234_v44 }
 0x3f5   :  { %2106 = vmatprep.subr.bf16.mxu0 %v3239_v45 }
 0x3f8   :  { %2107 = vmatpush1.bf16.msra.mxu0 %v3237_v46 }
 0x3f9   :  { %2108 = vmatprep.subr.bf16.mxu0 %v3242_v47  ;;  %v2463_v47 = vld [vmem:[#allocation2] sm:$0x1] }
 0x3fa   :  { %2466 = vperm.xlu0 %2967, %v2463_v47  }
 0x3fc   :  { %2109 = vmatpush1.bf16.msra.mxu0 %v3240_v48  ;;  %v2811_v48 = vld [vmem:[#allocation23] ss:$0 sm:$0xff] }
 0x3fd   :  { %2110 = vmatprep.subr.bf16.mxu0 %v3245_v51 }
 0x400   :  { %2111 = vmatpush1.bf16.msra.mxu0 %v3243_v52 }
 0x401   :  { %2112 = vmatprep.subr.bf16.mxu0 %v3248_v54 }
 0x404   :  { %2113 = vmatpush1.bf16.msra.mxu0 %v3246_v55 }
 0x405   :  { %2123 = vmatprep.subr.bf16.mxu0 %v3251_v57 }
 0x407   :  { %2115 = vmatmul.mubr.bf16.vlgmr.msra.gmra.mrb[12].mxu0 %v1546_v61 }
 0x408   :  { %2124 = vmatpush1.bf16.msra.mxu0 %v3249_v58  ;;  %2155 = vmatprep.mubr.bf16.mxu0 %v3671_v1  ;;  %v3267_v1 = vld [vmem:[#allocation15 + $0x260] ss:$8 sps:$4 sm:$0xff]  }
 0x409   :  { %2125 = vmatprep.subr.bf16.mxu0 %v3254_v59  ;;  %v2462_v59 = vld [vmem:[#allocation24] sm:$0x1] }
 0x40c   :  { %2126 = vmatpush1.bf16.msra.mxu0 %v3252_v29 }
 0x40d   :  { %2127 = vmatprep.subr.bf16.mxu0 %v3257_v43 }
 0x410   :  { %2128 = vmatpush1.bf16.msra.mxu0 %v3255_v50 }
 0x411   :  { %2129 = vmatprep.subr.bf16.mxu0 %v3260_v63 }
 0x414   :  { %2130 = vmatpush1.bf16.msra.mxu0 %v3258_v0 }
 0x415   :  { %2131 = vmatprep.subr.bf16.mxu0 %v3263_v2 }
 0x418   :  { %2132 = vmatpush1.bf16.msra.mxu0 %v3261_v3 }
 0x419   :  { %2133 = vmatprep.subr.bf16.mxu0 %v3266_v4 }
 0x41c   :  { %2134 = vmatpush1.bf16.msra.mxu0 %v3264_v5 }
 0x41d   :  { %2135 = vmatprep.subr.bf16.mxu0 %v3269_v6 }
 0x420   :  { %2136 = vmatpush1.bf16.msra.mxu0 %v3267_v1 }
 0x421   :  { %2137 = vmatprep.subr.bf16.mxu0 %v3272_v7 }
 0x424   :  { %2138 = vmatpush1.bf16.msra.mxu0 %v3270_v8 }
 0x427   :  { %2156 = vmatmul.mubr.bf16.vlgmr.msra.gmra.mrb[12].mxu0 %v1548_v10 }
 0x4fa   :  { %v2157_v18 = vpop.f32.mrb[12].mxu0 }
 0x4fb   :  { %v2923_v19 = vadd.f32 %v2157_v18, %v1634_v17  ;;  %v2159_v20 = vpop.f32.mrb[13].mxu0 }
 0x4fc   :  { %v2924_v21 = vadd.f32 %v2159_v20, %v1638_v14  ;;  %v2161_v22 = vpop.f32.mrb[14].mxu0 }
 0x4fd   :  { %v2164_v23 = vmax.f32 %v2923_v19, 0.0  ;;  %v2162_v24 = vpop.f32.mrb[15].mxu0 }
 0x4fe   :  { %v2165_v25 = vmax.f32 %v2924_v21, 0.0 }
 0x4ff   :  { %v2166_v30 = vpack.c.bf16 %v2164_v23, %v2164_v23 }
 0x500   :  { %v2167_v26 = vpack.c.bf16 %v2165_v25, %v2165_v25 }
 0x502   :  { %2335 = vmatprep.mubr.bf16.mxu1 %v2167_v26 }
 0x503   :  { %2336 = vmatmul.mubr.bf16.vlgmr.msra.gmra.mrb[16].mxu1 %v2166_v30 }
 0x504   :  { %2895 = vmatpush3.bf16.msra.mxu1 %v3289_v27  ;;  %2910 = vmatprep.mubr.msk.bf16.mxu1 %vm3673_vm4, %v3672_v28 }
 0x505   :  { %2896 = vmatprep.subr.bf16.mxu1 %v3672_v28 }
 0x508   :  { %2897 = vmatpush3.bf16.msra.mxu1 %v3290_v31 }
 0x509   :  { %2898 = vmatprep.subr.bf16.mxu1 %v3672_v28 }
 0x50c   :  { %2899 = vmatpush3.bf16.msra.mxu1 %v3291_v62 }
 0x50d   :  { %2900 = vmatprep.subr.bf16.mxu1 %v3672_v28 }
 0x510   :  { %2901 = vmatpush3.bf16.msra.mxu1 %v3292_v32 }
 0x511   :  { %2902 = vmatprep.subr.bf16.mxu1 %v3672_v28 }
 0x514   :  { %2903 = vmatpush3.bf16.msra.mxu1 %v3293_v33 }
 0x515   :  { %2904 = vmatprep.subr.bf16.mxu1 %v3672_v28 }
 0x518   :  { %2905 = vmatpush3.bf16.msra.mxu1 %v3294_v34 }
 0x519   :  { %2906 = vmatprep.subr.bf16.mxu1 %v3672_v28 }
 0x51c   :  { %2907 = vmatpush3.bf16.msra.mxu1 %v3295_v35 }
 0x51d   :  { %2908 = vmatprep.subr.bf16.mxu1 %v3672_v28 }
 0x520   :  { %2909 = vmatpush3.bf16.msra.mxu1 %v3296_v36 }
 0x521   :  { %2914 = vmatprep.subr.mxu1 %v3672_v28 }
 0x5d6   :  { %v2865_v37 = vpop.f32.mrb[16].mxu1 }
 0x5d7   :  { %v2866_v39 = vpop.f32.mrb[17].mxu1 }
 0x5d8   :  { %v2867_v40 = vadd.f32 %v2866_v39, %v2865_v37  ;;  %v2868_v41 = vpop.f32.mrb[18].mxu1 }
 0x5d9   :  { %v2869_v42 = vpop.f32.mrb[19].mxu1 }
 0x5da   :  { %v2338_v44 = vadd.f32 %v2867_v40, %v2794_v38 }
 0x5dc   :  { %v2343_v45 = vmax.f32 %v2338_v44, 0.0 }
 0x5de   :  { %v2344_v46 = vpack.c.bf16 %v2343_v45, %v2343_v45 }
 0x5e0   :  { %2911 = vmatmul.mubr.bf16.vlgmr.msra.gmra.mrb[20].mxu1 %v2344_v46 }
 0x5e1   :  { %2916 = vmatprep.mubr.msk.f32.mxu1 %vm3673_vm4, %v3672_v28  ;;  %v2467_v28 = vpop.permute.xlu0 %2466 }
 0x5e2   :  { %v2472_v29 = vrot.slane %v2467_v28, %v3938_v60 }
 0x6b3   :  { %v2450_v49 = vpop.f32.mrb[20].mxu1 }
 0x6b4   :  { %v2451_v51 = vadd.f32 %v2811_v48, %v2450_v49  ;;  %v2912_v52 = vpop.f32.mrb[21].mxu1 }
 0x6b5   :  { %v2453_v53 = vpop.f32.mrb[22].mxu1 }
 0x6b6   :  { %v2456_v54 = vsub.f32 0.0, %v2451_v51  ;;  %v2913_v55 = vpop.f32.mrb[23].mxu1 }
 0x6b8   :  { %v2457_v56 = vmul.f32 1.442695, %v2456_v54 }
 0x6ba   :  { %3297 = vpow2.f32 %v2457_v56 }
 0x6c4   :  { %v3298_v57 = vpop.eup %3297 }
 0x6c5   :  { %v2459_v58 = vadd.f32 1.0, %v3298_v57 }
 0x6c7   :  { %3299 = vrcp.f32 %v2459_v58 }
 0x6d1   :  { %v3300_v61 = vpop.eup %3299 }
 0x6d2   :  { %2915 = vmatpush3.xpose.msk.msra.mxu1 %vm1291_vm3, %v3300_v61 }
 0x6d5   :  { %2917 = vmatmul.mubr.msk.f32.vlgmr.msra.gmra.mrb[24].mxu1 %vm1291_vm3, %v2462_v59 }
 0x7a8   :  { %v2545_v43 = vpop.f32.mrb[24].mxu1 }
 0x7a9   :  { %v2546_v50 = vadd.f32 %v2545_v43, %v2472_v29  ;;  %v2918_v63 = vpop.f32.mrb[25].mxu1 }
 0x7ab   :  { %2550 = vst.msk [vmem:[#allocation26] sm:$0x1] %vm2549_vm5, %v2546_v50 }
 0x7ac   :  { %3620 = shalt.err (!%p3617_p4)
}
 0x7ad   :  { %s3621_s22 = scalar_lea.hbm %s4040_s15, 16 }
 0x7ae   :  { %p3622_p5 = scmp.ne.s32.totalorder %s4040_s15, %s3621_s22  ;;  %p3625_p6 = scmp.lt.u32.totalorder %s3621_s22, %s4040_s15 }
 0x7b0   :  { %p3627_p7 = pnand %p3625_p6, %p3622_p5 }
 0x7b2   :  { %3630 = shalt.err (!%p3627_p7)
}
 0x7b3   :  { %2560 = dma.vmem_to_hbm [thread:$0]  %s2558_s27, 16, %s4040_s15, [#allocation5]  }
 0x7b4   :  { %3647 = dma.done.wait [#allocation5], 16  }
 0x7b5   :  { %3648 = vsyncadd [#allocation5], 4294967280 }
 0x7b6   :  { %2564 = vsyncpa [#allocation4], 1 }
 0x7b7   :  { %2565 = vsyncpa [#allocation7], 1 }
 0x7b8   :  { %2566 = vsyncpa [#allocation10], 1 }
 0x7b9   :  { %2567 = vsyncpa [#allocation13], 1 }
 0x7ba   :  { %2568 = vsyncpa [#allocation16], 1 }
 0x7bb   :  { %2569 = vsyncpa [#allocation19], 1 }
 0x7bc   :  { %2570 = vsyncpa [#allocation22], 1 }
 0x7bd   :  { %2571 = vsyncpa [#allocation25], 1 }
 0x7be   :  { %2572 = vsyncpa [#allocation5], 1 }

</bundles_post_ra>
